<compile_context>
chip_gen: v7x
topology: tpu7x:2x2x1
jax: 0.10.0
libtpu: 0.0.40
codegen_flags: <defaults>
</compile_context>

<pallas_src>
import math
import functools

import jax
import jax.numpy as jnp
from jax import lax
from jax.experimental import pallas as pl
from jax.experimental.pallas import tpu as pltpu


_SQRT_2_OVER_PI = math.sqrt(2.0 / math.pi)


def _vmem_limit_bytes():
    # ~75% of per-core VMEM: ~48 MiB on v7x (64 MiB), ~96 MiB on v5e/v6e (128 MiB).
    try:
        cap = int(getattr(pltpu.get_tpu_info(), "vmem_capacity_bytes",
                          64 * 1024 * 1024))
    except Exception:
        cap = 64 * 1024 * 1024
    return max(32 * 1024 * 1024, min((cap * 3) // 4, 112 * 1024 * 1024))


_COMPILER_PARAMS = pltpu.CompilerParams(
    dimension_semantics=("parallel",),
    vmem_limit_bytes=_vmem_limit_bytes(),
)


# --------------------------------------------------------------------------- #
# small helpers
# --------------------------------------------------------------------------- #
def _gelu_tanh(x):
    # torch.nn.functional.gelu(..., approximate='tanh'); tanh -> EUP slot.
    return 0.5 * x * (1.0 + jnp.tanh(_SQRT_2_OVER_PI * (x + 0.044715 * x * x * x)))


def _rms_normed(x_f32, lnw_ref, eps):
    # T5LayerNorm: w * x * rsqrt(mean(x^2) + eps)   (no mean subtraction)
    var = jnp.mean(x_f32 * x_f32, axis=-1, keepdims=True)
    return lnw_ref[...].astype(jnp.float32) * (x_f32 * lax.rsqrt(var + eps))


def _round_up(n, m):
    return ((n + m - 1) // m) * m


def _const_spec(shape):
    # resident operand (weights / LN weight / bias): constant index map across the
    # grid -> never refetched, so a single buffer is enough.
    nd = len(shape)
    return pl.BlockSpec(shape, lambda i: (0,) * nd, pipeline_mode=pl.Buffered(1))


def _pick_tm(m):
    # Row tile for token-tiled kernels: minimize padding waste (<=12.5% preferred),
    # prefer >=2 grid steps (both v7x TensorCores), prefer larger tiles on ties.
    best_key, best = None, None
    for cand in (512, 256, 128, 64, 32, 16, 8):
        mp = _round_up(m, cand)
        waste = mp - m
        ok = waste * 8 <= mp
        grid = mp // cand
        key = (0 if ok else 1,
               0 if (grid >= 2 or cand == 8) else 1,
               0 if ok else waste,
               -cand)
        if best_key is None or key < best_key:
            best_key, best = key, (cand, mp)
    return best


# --------------------------------------------------------------------------- #
# kernels
# --------------------------------------------------------------------------- #
def _t5_block_kernel(x_ref, bias_ref, attn_lnw_ref, wqkv_ref, wo_ref,
                     ff_lnw_ref, wi_ref, woff_ref, o_ref, *, num_heads, eps):
    """Whole T5Block for one batch element: LN->QKV->attn(+bias)->O+res->LN->FF+res."""
    f32 = jnp.float32
    cdt = jnp.bfloat16  # MXU compute dtype

    S = x_ref.shape[1]
    D = x_ref.shape[2]
    I = wqkv_ref.shape[1] // 3
    dh = I // num_heads
    F = wi_ref.shape[1] // 2

    # ---- self-attention sub-layer ------------------------------------------
    xn = _rms_normed(x_ref[0].astype(f32), attn_lnw_ref, eps).astype(cdt)
    # fused (D, 3I) weight: one LHS push feeds q|k|v
    qkv = jnp.dot(xn, wqkv_ref[...], preferred_element_type=f32).astype(cdt)

    bias = bias_ref[0].astype(f32)        # (H, S, S)
    wo = wo_ref[...]                      # (I, D) bf16
    y = jnp.zeros((S, D), f32)
    dn = (((1,), (1,)), ((), ()))         # contract last dims: q @ k^T without transpose
    # TODO(synk): static per-head loop; for large H / long S switch to a batched
    # einsum + flash-style KV tiling (online softmax) instead of unrolling.
    for h in range(num_heads):
        q_h = qkv[:, h * dh:(h + 1) * dh]
        k_h = qkv[:, I + h * dh:I + (h + 1) * dh]
        v_h = qkv[:, 2 * I + h * dh:2 * I + (h + 1) * dh]
        # T5: k is pre-scaled by sqrt(dh) and SDPA divides by sqrt(dh) -> net
        # logits are unscaled q @ k^T plus the additive relative-position bias.
        s = lax.dot_general(q_h, k_h, dn, preferred_element_type=f32) + bias[h]
        m = jnp.max(s, axis=-1, keepdims=True)
        p = jnp.exp(s - m)
        p = p * pl.reciprocal(jnp.sum(p, axis=-1, keepdims=True), approx=True)
        o_h = jnp.dot(p.astype(cdt), v_h, preferred_element_type=f32)
        # fold the per-head slice of the O-projection into the loop: no head concat,
        # every matmul lane-aligned.
        y = y + jnp.dot(o_h.astype(cdt), wo[h * dh:(h + 1) * dh, :],
                        preferred_element_type=f32)
    x1 = x_ref[0].astype(f32) + y         # attention residual (re-read ref; no long f32 live range)

    # ---- feed-forward sub-layer ---------------------------------------------
    xn = _rms_normed(x1, ff_lnw_ref, eps).astype(cdt)
    hidden = jnp.dot(xn, wi_ref[...], preferred_element_type=f32)   # (S, 2F) fused wi0|wi1
    hgate = _gelu_tanh(hidden[:, :F])
    hlin = hidden[:, F:]
    hmul = (hgate * hlin).astype(cdt)
    ff = jnp.dot(hmul, woff_ref[...], preferred_element_type=f32)
    o_ref[0] = (x1 + ff).astype(o_ref.dtype)
    # TODO(synk): at production T5 dims (D=4096, F=10240) the resident bf16 weights
    # exceed VMEM (esp. v7x 64 MiB); add an "arbitrary" contraction grid axis with an
    # f32 accumulator / stream weight tiles via pltpu.emit_pipeline.


def _rmsnorm_kernel(x_ref, lnw_ref, o_ref, *, eps):
    o_ref[...] = _rms_normed(x_ref[...].astype(jnp.float32),
                             lnw_ref, eps).astype(o_ref.dtype)


# --------------------------------------------------------------------------- #
# pallas_call wrappers
# --------------------------------------------------------------------------- #
@functools.partial(jax.jit, static_argnames=("num_heads", "eps"))
def t5_block_forward(x, bias, attn_ln, wqkv, wo, ff_ln, wi, wo_ff, *,
                     num_heads, eps=1e-6):
    """x: (B, S, D) f32 residual stream. bias: (1, H, S, S). Weights bf16, (in, out)."""
    B, S, D = x.shape
    H = num_heads
    # TODO(synk): grid=(B,) leaves one v7x TensorCore idle when B == 1; split the
    # query axis into a second parallel grid dim for that case.
    return pl.pallas_call(
        functools.partial(_t5_block_kernel, num_heads=num_heads, eps=eps),
        out_shape=jax.ShapeDtypeStruct((B, S, D), x.dtype),
        grid_spec=pltpu.PrefetchScalarGridSpec(
            num_scalar_prefetch=0,
            grid=(B,),
            in_specs=[
                pl.BlockSpec((1, S, D), lambda b: (b, 0, 0)),
                _const_spec((1, H, S, S)),     # TODO(synk): bf16 / KV-tile bias for large H*S^2
                _const_spec((1, D)),
                _const_spec(wqkv.shape),
                _const_spec(wo.shape),
                _const_spec((1, D)),
                _const_spec(wi.shape),
                _const_spec(wo_ff.shape),
            ],
            out_specs=pl.BlockSpec((1, S, D), lambda b: (b, 0, 0)),
        ),
        compiler_params=_COMPILER_PARAMS,
    )(x, bias, attn_ln.reshape(1, D), wqkv, wo, ff_ln.reshape(1, D), wi, wo_ff)


@functools.partial(jax.jit, static_argnames=("eps",))
def t5_rmsnorm(x, ln_w, *, eps=1e-6):
    B, S, D = x.shape
    M = B * S
    tm, Mp = _pick_tm(M)
    x2d = x.reshape(M, D)
    if Mp != M:
        x2d = jnp.pad(x2d, ((0, Mp - M), (0, 0)))
    out = pl.pallas_call(
        functools.partial(_rmsnorm_kernel, eps=eps),
        out_shape=jax.ShapeDtypeStruct((Mp, D), x.dtype),
        grid_spec=pltpu.PrefetchScalarGridSpec(
            num_scalar_prefetch=0,
            grid=(Mp // tm,),
            in_specs=[pl.BlockSpec((tm, D), lambda i: (i, 0)),
                      _const_spec((1, D))],
            out_specs=pl.BlockSpec((tm, D), lambda i: (i, 0)),
        ),
        compiler_params=_COMPILER_PARAMS,
    )(x2d, ln_w.reshape(1, D))
    return out[:M].reshape(B, S, D)


# --------------------------------------------------------------------------- #
# relative position bias (tiny int math + gather, left to XLA)
# --------------------------------------------------------------------------- #
def _relative_position_bucket(relative_position, bidirectional=True,
                              num_buckets=32, max_distance=128):
    relative_buckets = jnp.zeros_like(relative_position)
    if bidirectional:
        num_buckets //= 2
        relative_buckets = relative_buckets + (
            (relative_position > 0).astype(jnp.int32) * num_buckets)
        relative_position = jnp.abs(relative_position)
    else:
        relative_position = -jnp.minimum(relative_position,
                                         jnp.zeros_like(relative_position))
    max_exact = num_buckets // 2
    is_small = relative_position < max_exact
    # clamp to >=1 so log(0) never reaches the float->int cast (result discarded anyway)
    rel_if_large = max_exact + (
        jnp.log(jnp.maximum(relative_position, 1).astype(jnp.float32) / max_exact)
        / math.log(max_distance / max_exact)
        * (num_buckets - max_exact)
    ).astype(jnp.int32)
    rel_if_large = jnp.minimum(rel_if_large, num_buckets - 1)
    return relative_buckets + jnp.where(is_small, relative_position, rel_if_large)


def compute_relative_bias(rel_bias_table, seq_len, num_heads):
    # TODO(synk): bucket math + embedding gather left to XLA (tiny, int-heavy).
    context_position = jnp.arange(seq_len, dtype=jnp.int32)[:, None]
    memory_position = jnp.arange(seq_len, dtype=jnp.int32)[None, :]
    relative_position = memory_position - context_position
    buckets = _relative_position_bucket(
        relative_position, bidirectional=True,
        num_buckets=rel_bias_table.shape[0], max_distance=128)
    values = rel_bias_table[buckets]                 # (S, S, H)
    del num_heads
    return jnp.transpose(values, (2, 0, 1))[None]    # (1, H, S, S)


# --------------------------------------------------------------------------- #
# one-time parameter prep: fuse + pre-transpose + bf16 cast (checkpoint-load time)
# --------------------------------------------------------------------------- #
def prepare_params(params, compute_dtype=jnp.bfloat16):
    """Fuse QKV -> (D,3I) and wi0|wi1 -> (D,2F); cast matmul weights to bf16.
    (PyTorch Linear weights of shape (out,in) would be transposed to (in,out)
    exactly once here as well.)"""
    blocks = []
    for blk in params["blocks"]:
        blocks.append(dict(
            attn_ln=blk["attn_ln"].astype(jnp.float32),
            wqkv=jnp.concatenate([blk["wq"], blk["wk"], blk["wv"]],
                                 axis=1).astype(compute_dtype),
            wo=blk["wo_attn"].astype(compute_dtype),
            ff_ln=blk["ff_ln"].astype(jnp.float32),
            wi=jnp.concatenate([blk["wi0"], blk["wi1"]],
                               axis=1).astype(compute_dtype),
            wo_ff=blk["wo_ff"].astype(compute_dtype),
        ))
    return dict(
        embed_tokens=params["embed_tokens"].astype(jnp.float32),
        relative_attention_bias=params["relative_attention_bias"].astype(jnp.float32),
        blocks=blocks,
        final_ln=params["final_ln"].astype(jnp.float32),
    )


# --------------------------------------------------------------------------- #
# full T5Stack forward
# --------------------------------------------------------------------------- #
def t5_stack_forward(params, input_ids, *, num_heads, eps=1e-6,
                     intermediate_output=None, final_layer_norm_intermediate=True):
    # TODO(synk): token-embedding gather done via XLA (data-dependent gather).
    x = jnp.take(params["embed_tokens"], input_ids, axis=0)       # (B, S, D) f32
    seq_len = input_ids.shape[1]
    # Only block 0 owns the relative-attention-bias table; the same bias is reused
    # (as `past_bias`) by every subsequent block.
    bias = compute_relative_bias(params["relative_attention_bias"],
                                 seq_len, num_heads)              # (1, H, S, S) f32
    intermediate = None
    for i, blk in enumerate(params["blocks"]):
        x = t5_block_forward(x, bias, blk["attn_ln"], blk["wqkv"], blk["wo"],
                             blk["ff_ln"], blk["wi"], blk["wo_ff"],
                             num_heads=num_heads, eps=eps)
        if i == intermediate_output:
            intermediate = x
    x = t5_rmsnorm(x, params["final_ln"], eps=eps)
    if intermediate is not None and final_layer_norm_intermediate:
        intermediate = t5_rmsnorm(intermediate, params["final_ln"], eps=eps)
    return x, intermediate


# --------------------------------------------------------------------------- #
# pure-JAX f32 reference (same math as the PyTorch module, no Pallas)
# --------------------------------------------------------------------------- #
def _rmsnorm_ref(x, w, eps=1e-6):
    xf = x.astype(jnp.float32)
    var = jnp.mean(xf * xf, axis=-1, keepdims=True)
    return (w * (xf * lax.rsqrt(var + eps))).astype(x.dtype)


def t5_stack_reference(params, input_ids, *, num_heads, eps=1e-6):
    x = jnp.take(params["embed_tokens"], input_ids, axis=0)
    B, S, _ = x.shape
    bias = compute_relative_bias(params["relative_attention_bias"], S, num_heads)
    H = num_heads
    for blk in params["blocks"]:
        xn = _rmsnorm_ref(x, blk["attn_ln"], eps)
        q = xn @ blk["wq"]
        k = xn @ blk["wk"]
        v = xn @ blk["wv"]
        dh = q.shape[-1] // H
        q4 = q.reshape(B, S, H, dh).transpose(0, 2, 1, 3)
        k4 = k.reshape(B, S, H, dh).transpose(0, 2, 1, 3)
        v4 = v.reshape(B, S, H, dh).transpose(0, 2, 1, 3)
        s = jnp.einsum("bhqd,bhkd->bhqk", q4, k4) + bias
        p = jax.nn.softmax(s, axis=-1)
        o = jnp.einsum("bhqk,bhkd->bhqd", p, v4)
        o = o.transpose(0, 2, 1, 3).reshape(B, S, H * dh)
        x = x + o @ blk["wo_attn"]
        xn = _rmsnorm_ref(x, blk["ff_ln"], eps)
        x = x + (_gelu_tanh(xn @ blk["wi0"]) * (xn @ blk["wi1"])) @ blk["wo_ff"]
    return _rmsnorm_ref(x, params["final_ln"], eps)


# --------------------------------------------------------------------------- #
# demo / self-test
# --------------------------------------------------------------------------- #
if __name__ == "__main__":
    # Small but lane-dense config: D, F multiples of 128 and head_dim = 128 so
    # every per-head slice / matmul is lane-aligned.
    num_layers = 2
    model_dim = 128
    inner_dim = 256          # num_heads * head_dim
    ff_dim = 256
    num_heads = 2            # head_dim = 128
    vocab_size = 512
    batch, seq = 2, 8

    key = jax.random.PRNGKey(0)
    kemb, krel, kids, kfinal, *kblocks = jax.random.split(key, 4 + num_layers)

    def linear_weight(k, din, dout, scale=1.0):
        # stored pre-transposed as (in, out)
        return scale * jax.random.normal(k, (din, dout), jnp.float32) / math.sqrt(din)

    blocks = []
    for kb in kblocks:
        ks = jax.random.split(kb, 9)
        blocks.append(dict(
            attn_ln=1.0 + 0.05 * jax.random.normal(ks[7], (model_dim,), jnp.float32),
            # extra 0.3 on q/k keeps attention logits O(1) -> well-conditioned test
            wq=linear_weight(ks[0], model_dim, inner_dim, scale=0.3),
            wk=linear_weight(ks[1], model_dim, inner_dim, scale=0.3),
            wv=linear_weight(ks[2], model_dim, inner_dim),
            wo_attn=linear_weight(ks[3], inner_dim, model_dim),
            ff_ln=1.0 + 0.05 * jax.random.normal(ks[8], (model_dim,), jnp.float32),
            wi0=linear_weight(ks[4], model_dim, ff_dim),
            wi1=linear_weight(ks[5], model_dim, ff_dim),
            wo_ff=linear_weight(ks[6], ff_dim, model_dim),
        ))

    params = dict(
        embed_tokens=jax.random.normal(kemb, (vocab_size, model_dim), jnp.float32),
        relative_attention_bias=0.5 * jax.random.normal(krel, (32, num_heads), jnp.float32),
        blocks=blocks,
        final_ln=1.0 + 0.05 * jax.random.normal(kfinal, (model_dim,), jnp.float32),
    )

    input_ids = jax.random.randint(kids, (batch, seq), 0, vocab_size, dtype=jnp.int32)

    prepped = prepare_params(params)                     # fuse + bf16 once
    y, _ = t5_stack_forward(prepped, input_ids, num_heads=num_heads)
    y = jax.block_until_ready(y)

    y_ref = t5_stack_reference(params, input_ids, num_heads=num_heads)
    max_err = float(jnp.max(jnp.abs(y - y_ref)))
    assert jnp.allclose(y, y_ref, atol=5e-2, rtol=5e-2), (
        f"mismatch vs f32 reference (bf16 MXU path), max abs err={max_err}")

    print("KERNEL_OK")
</pallas_src>

<mosaic_0001>
module attributes {stable_mosaic.version = 11 : i64} {
  func.func @_t5_block_kernel(%arg0: i32, %arg1: memref<1x8x128xf32, #tpu.memory_space<vmem>>, %arg2: memref<1x2x8x8xf32, #tpu.memory_space<vmem>>, %arg3: memref<1x128xf32, #tpu.memory_space<vmem>>, %arg4: memref<128x768xbf16, #tpu.memory_space<vmem>>, %arg5: memref<256x128xbf16, #tpu.memory_space<vmem>>, %arg6: memref<1x128xf32, #tpu.memory_space<vmem>>, %arg7: memref<128x512xbf16, #tpu.memory_space<vmem>>, %arg8: memref<256x128xbf16, #tpu.memory_space<vmem>>, %arg9: memref<1x8x128xf32, #tpu.memory_space<vmem>>) attributes {dimension_semantics = [#tpu.dimension_semantics<parallel>], iteration_bounds = array<i64: 2>, scalar_prefetch = 0 : i64, scratch_operands = 0 : i64, tpu.core_type = #tpu.core_type<tc>, window_params = [{transform_indices = @transform_0, window_bounds = array<i64: 1, 8, 128>}, {pipeline_mode = #tpu.pipeline_mode<synchronous>, transform_indices = @transform_1, window_bounds = array<i64: 1, 2, 8, 8>}, {pipeline_mode = #tpu.pipeline_mode<synchronous>, transform_indices = @transform_2, window_bounds = array<i64: 1, 128>}, {pipeline_mode = #tpu.pipeline_mode<synchronous>, transform_indices = @transform_3, window_bounds = array<i64: 128, 768>}, {pipeline_mode = #tpu.pipeline_mode<synchronous>, transform_indices = @transform_4, window_bounds = array<i64: 256, 128>}, {pipeline_mode = #tpu.pipeline_mode<synchronous>, transform_indices = @transform_5, window_bounds = array<i64: 1, 128>}, {pipeline_mode = #tpu.pipeline_mode<synchronous>, transform_indices = @transform_6, window_bounds = array<i64: 128, 512>}, {pipeline_mode = #tpu.pipeline_mode<synchronous>, transform_indices = @transform_7, window_bounds = array<i64: 256, 128>}, {transform_indices = @transform_8, window_bounds = array<i64: 1, 8, 128>}]} {
    %c0 = arith.constant 0 : index
    %c0_0 = arith.constant 0 : index
    %c0_1 = arith.constant 0 : index
    %0 = vector.load %arg1[%c0, %c0_0, %c0_1] : memref<1x8x128xf32, #tpu.memory_space<vmem>>, vector<1x8x128xf32>
    %1 = vector.shape_cast %0 : vector<1x8x128xf32> to vector<8x128xf32>
    %2 = arith.mulf %1, %1 : vector<8x128xf32>
    %cst = arith.constant dense<0.000000e+00> : vector<8xf32>
    %3 = vector.multi_reduction <add>, %2, %cst [1] : vector<8x128xf32> to vector<8xf32>
    %4 = vector.shape_cast %3 : vector<8xf32> to vector<8x1xf32>
    %cst_2 = arith.constant 1.280000e+02 : f32
    %5 = vector.broadcast %cst_2 : f32 to vector<8x1xf32>
    %6 = arith.divf %4, %5 : vector<8x1xf32>
    %c0_3 = arith.constant 0 : index
    %c0_4 = arith.constant 0 : index
    %7 = vector.load %arg3[%c0_3, %c0_4] : memref<1x128xf32, #tpu.memory_space<vmem>>, vector<1x128xf32>
    %cst_5 = arith.constant 9.99999997E-7 : f32
    %8 = vector.broadcast %cst_5 : f32 to vector<8x1xf32>
    %9 = arith.addf %6, %8 : vector<8x1xf32>
    %10 = math.rsqrt %9 : vector<8x1xf32>
    %11 = vector.broadcast %10 : vector<8x1xf32> to vector<8x128xf32>
    %12 = arith.mulf %1, %11 : vector<8x128xf32>
    %13 = vector.broadcast %7 : vector<1x128xf32> to vector<8x128xf32>
    %14 = arith.mulf %13, %12 : vector<8x128xf32>
    %15 = arith.truncf %14 : vector<8x128xf32> to vector<8x128xbf16>
    %c0_6 = arith.constant 0 : index
    %c0_7 = arith.constant 0 : index
    %16 = vector.load %arg4[%c0_6, %c0_7] : memref<128x768xbf16, #tpu.memory_space<vmem>>, vector<128x768xbf16>
    %cst_8 = arith.constant dense<0.000000e+00> : vector<8x768xf32>
    %17 = tpu.matmul %15, %16, %cst_8 {dimension_numbers = #tpu.dot_dimension_numbers<[1], [0], [0], [1], [0, 0, 1, 1], [], []>} : vector<8x128xbf16>, vector<128x768xbf16>, vector<8x768xf32> -> vector<8x768xf32>
    %18 = arith.truncf %17 : vector<8x768xf32> to vector<8x768xbf16>
    %c0_9 = arith.constant 0 : index
    %c0_10 = arith.constant 0 : index
    %c0_11 = arith.constant 0 : index
    %c0_12 = arith.constant 0 : index
    %19 = vector.load %arg2[%c0_9, %c0_10, %c0_11, %c0_12] : memref<1x2x8x8xf32, #tpu.memory_space<vmem>>, vector<1x2x8x8xf32>
    %20 = vector.shape_cast %19 : vector<1x2x8x8xf32> to vector<2x8x8xf32>
    %c0_13 = arith.constant 0 : index
    %c0_14 = arith.constant 0 : index
    %21 = vector.load %arg5[%c0_13, %c0_14] : memref<256x128xbf16, #tpu.memory_space<vmem>>, vector<256x128xbf16>
    %cst_15 = arith.constant 0.000000e+00 : f32
    %22 = vector.broadcast %cst_15 : f32 to vector<8x128xf32>
    %23 = vector.extract_strided_slice %18 {offsets = [0, 0], sizes = [8, 128], strides = [1, 1]} : vector<8x768xbf16> to vector<8x128xbf16>
    %24 = vector.extract_strided_slice %18 {offsets = [0, 256], sizes = [8, 128], strides = [1, 1]} : vector<8x768xbf16> to vector<8x128xbf16>
    %25 = vector.extract_strided_slice %18 {offsets = [0, 512], sizes = [8, 128], strides = [1, 1]} : vector<8x768xbf16> to vector<8x128xbf16>
    %cst_16 = arith.constant dense<0.000000e+00> : vector<8x8xf32>
    %26 = tpu.matmul %23, %24, %cst_16 {dimension_numbers = #tpu.dot_dimension_numbers<[1], [1], [0], [0], [0, 0, 1, 0], [], []>} : vector<8x128xbf16>, vector<8x128xbf16>, vector<8x8xf32> -> vector<8x8xf32>
    %27 = vector.extract_strided_slice %20 {offsets = [0, 0, 0], sizes = [1, 8, 8], strides = [1, 1, 1]} : vector<2x8x8xf32> to vector<1x8x8xf32>
    %28 = vector.shape_cast %27 : vector<1x8x8xf32> to vector<8x8xf32>
    %29 = arith.addf %26, %28 : vector<8x8xf32>
    %cst_17 = arith.constant dense<0xFF800000> : vector<8xf32>
    %30 = vector.multi_reduction <maximumf>, %29, %cst_17 [1] : vector<8x8xf32> to vector<8xf32>
    %31 = vector.shape_cast %30 : vector<8xf32> to vector<8x1xf32>
    %32 = vector.broadcast %31 : vector<8x1xf32> to vector<8x8xf32>
    %33 = arith.subf %29, %32 : vector<8x8xf32>
    %34 = math.exp %33 : vector<8x8xf32>
    %cst_18 = arith.constant dense<0.000000e+00> : vector<8xf32>
    %35 = vector.multi_reduction <add>, %34, %cst_18 [1] : vector<8x8xf32> to vector<8xf32>
    %36 = vector.shape_cast %35 : vector<8xf32> to vector<8x1xf32>
    %37 = tpu.reciprocal %36 {approx = true} : vector<8x1xf32> -> vector<8x1xf32>
    %38 = vector.broadcast %37 : vector<8x1xf32> to vector<8x8xf32>
    %39 = arith.mulf %34, %38 : vector<8x8xf32>
    %40 = arith.truncf %39 : vector<8x8xf32> to vector<8x8xbf16>
    %cst_19 = arith.constant dense<0.000000e+00> : vector<8x128xf32>
    %41 = tpu.matmul %40, %25, %cst_19 {dimension_numbers = #tpu.dot_dimension_numbers<[1], [0], [0], [1], [0, 0, 1, 1], [], []>} : vector<8x8xbf16>, vector<8x128xbf16>, vector<8x128xf32> -> vector<8x128xf32>
    %42 = arith.truncf %41 : vector<8x128xf32> to vector<8x128xbf16>
    %43 = vector.extract_strided_slice %21 {offsets = [0, 0], sizes = [128, 128], strides = [1, 1]} : vector<256x128xbf16> to vector<128x128xbf16>
    %cst_20 = arith.constant dense<0.000000e+00> : vector<8x128xf32>
    %44 = tpu.matmul %42, %43, %cst_20 {dimension_numbers = #tpu.dot_dimension_numbers<[1], [0], [0], [1], [0, 0, 1, 1], [], []>} : vector<8x128xbf16>, vector<128x128xbf16>, vector<8x128xf32> -> vector<8x128xf32>
    %45 = arith.addf %22, %44 : vector<8x128xf32>
    %46 = vector.extract_strided_slice %18 {offsets = [0, 128], sizes = [8, 128], strides = [1, 1]} : vector<8x768xbf16> to vector<8x128xbf16>
    %47 = vector.extract_strided_slice %18 {offsets = [0, 384], sizes = [8, 128], strides = [1, 1]} : vector<8x768xbf16> to vector<8x128xbf16>
    %48 = vector.extract_strided_slice %18 {offsets = [0, 640], sizes = [8, 128], strides = [1, 1]} : vector<8x768xbf16> to vector<8x128xbf16>
    %cst_21 = arith.constant dense<0.000000e+00> : vector<8x8xf32>
    %49 = tpu.matmul %46, %47, %cst_21 {dimension_numbers = #tpu.dot_dimension_numbers<[1], [1], [0], [0], [0, 0, 1, 0], [], []>} : vector<8x128xbf16>, vector<8x128xbf16>, vector<8x8xf32> -> vector<8x8xf32>
    %50 = vector.extract_strided_slice %20 {offsets = [1, 0, 0], sizes = [1, 8, 8], strides = [1, 1, 1]} : vector<2x8x8xf32> to vector<1x8x8xf32>
    %51 = vector.shape_cast %50 : vector<1x8x8xf32> to vector<8x8xf32>
    %52 = arith.addf %49, %51 : vector<8x8xf32>
    %cst_22 = arith.constant dense<0xFF800000> : vector<8xf32>
    %53 = vector.multi_reduction <maximumf>, %52, %cst_22 [1] : vector<8x8xf32> to vector<8xf32>
    %54 = vector.shape_cast %53 : vector<8xf32> to vector<8x1xf32>
    %55 = vector.broadcast %54 : vector<8x1xf32> to vector<8x8xf32>
    %56 = arith.subf %52, %55 : vector<8x8xf32>
    %57 = math.exp %56 : vector<8x8xf32>
    %cst_23 = arith.constant dense<0.000000e+00> : vector<8xf32>
    %58 = vector.multi_reduction <add>, %57, %cst_23 [1] : vector<8x8xf32> to vector<8xf32>
    %59 = vector.shape_cast %58 : vector<8xf32> to vector<8x1xf32>
    %60 = tpu.reciprocal %59 {approx = true} : vector<8x1xf32> -> vector<8x1xf32>
    %61 = vector.broadcast %60 : vector<8x1xf32> to vector<8x8xf32>
    %62 = arith.mulf %57, %61 : vector<8x8xf32>
    %63 = arith.truncf %62 : vector<8x8xf32> to vector<8x8xbf16>
    %cst_24 = arith.constant dense<0.000000e+00> : vector<8x128xf32>
    %64 = tpu.matmul %63, %48, %cst_24 {dimension_numbers = #tpu.dot_dimension_numbers<[1], [0], [0], [1], [0, 0, 1, 1], [], []>} : vector<8x8xbf16>, vector<8x128xbf16>, vector<8x128xf32> -> vector<8x128xf32>
    %65 = arith.truncf %64 : vector<8x128xf32> to vector<8x128xbf16>
    %66 = vector.extract_strided_slice %21 {offsets = [128, 0], sizes = [128, 128], strides = [1, 1]} : vector<256x128xbf16> to vector<128x128xbf16>
    %cst_25 = arith.constant dense<0.000000e+00> : vector<8x128xf32>
    %67 = tpu.matmul %65, %66, %cst_25 {dimension_numbers = #tpu.dot_dimension_numbers<[1], [0], [0], [1], [0, 0, 1, 1], [], []>} : vector<8x128xbf16>, vector<128x128xbf16>, vector<8x128xf32> -> vector<8x128xf32>
    %68 = arith.addf %45, %67 : vector<8x128xf32>
    %c0_26 = arith.constant 0 : index
    %c0_27 = arith.constant 0 : index
    %c0_28 = arith.constant 0 : index
    %69 = vector.load %arg1[%c0_26, %c0_27, %c0_28] : memref<1x8x128xf32, #tpu.memory_space<vmem>>, vector<1x8x128xf32>
    %70 = vector.shape_cast %69 : vector<1x8x128xf32> to vector<8x128xf32>
    %71 = arith.addf %70, %68 : vector<8x128xf32>
    %72 = arith.mulf %71, %71 : vector<8x128xf32>
    %cst_29 = arith.constant dense<0.000000e+00> : vector<8xf32>
    %73 = vector.multi_reduction <add>, %72, %cst_29 [1] : vector<8x128xf32> to vector<8xf32>
    %74 = vector.shape_cast %73 : vector<8xf32> to vector<8x1xf32>
    %cst_30 = arith.constant 1.280000e+02 : f32
    %75 = vector.broadcast %cst_30 : f32 to vector<8x1xf32>
    %76 = arith.divf %74, %75 : vector<8x1xf32>
    %c0_31 = arith.constant 0 : index
    %c0_32 = arith.constant 0 : index
    %77 = vector.load %arg6[%c0_31, %c0_32] : memref<1x128xf32, #tpu.memory_space<vmem>>, vector<1x128xf32>
    %cst_33 = arith.constant 9.99999997E-7 : f32
    %78 = vector.broadcast %cst_33 : f32 to vector<8x1xf32>
    %79 = arith.addf %76, %78 : vector<8x1xf32>
    %80 = math.rsqrt %79 : vector<8x1xf32>
    %81 = vector.broadcast %80 : vector<8x1xf32> to vector<8x128xf32>
    %82 = arith.mulf %71, %81 : vector<8x128xf32>
    %83 = vector.broadcast %77 : vector<1x128xf32> to vector<8x128xf32>
    %84 = arith.mulf %83, %82 : vector<8x128xf32>
    %85 = arith.truncf %84 : vector<8x128xf32> to vector<8x128xbf16>
    %c0_34 = arith.constant 0 : index
    %c0_35 = arith.constant 0 : index
    %86 = vector.load %arg7[%c0_34, %c0_35] : memref<128x512xbf16, #tpu.memory_space<vmem>>, vector<128x512xbf16>
    %cst_36 = arith.constant dense<0.000000e+00> : vector<8x512xf32>
    %87 = tpu.matmul %85, %86, %cst_36 {dimension_numbers = #tpu.dot_dimension_numbers<[1], [0], [0], [1], [0, 0, 1, 1], [], []>} : vector<8x128xbf16>, vector<128x512xbf16>, vector<8x512xf32> -> vector<8x512xf32>
    %88 = vector.extract_strided_slice %87 {offsets = [0, 0], sizes = [8, 256], strides = [1, 1]} : vector<8x512xf32> to vector<8x256xf32>
    %cst_37 = arith.constant 5.000000e-01 : f32
    %89 = vector.broadcast %cst_37 : f32 to vector<8x256xf32>
    %90 = arith.mulf %89, %88 : vector<8x256xf32>
    %cst_38 = arith.constant 4.471500e-02 : f32
    %91 = vector.broadcast %cst_38 : f32 to vector<8x256xf32>
    %92 = arith.mulf %91, %88 : vector<8x256xf32>
    %93 = arith.mulf %92, %88 : vector<8x256xf32>
    %94 = arith.mulf %93, %88 : vector<8x256xf32>
    %95 = arith.addf %88, %94 : vector<8x256xf32>
    %cst_39 = arith.constant 0.797884583 : f32
    %96 = vector.broadcast %cst_39 : f32 to vector<8x256xf32>
    %97 = arith.mulf %96, %95 : vector<8x256xf32>
    %98 = math.tanh %97 : vector<8x256xf32>
    %cst_40 = arith.constant 1.000000e+00 : f32
    %99 = vector.broadcast %cst_40 : f32 to vector<8x256xf32>
    %100 = arith.addf %99, %98 : vector<8x256xf32>
    %101 = arith.mulf %90, %100 : vector<8x256xf32>
    %102 = vector.extract_strided_slice %87 {offsets = [0, 256], sizes = [8, 256], strides = [1, 1]} : vector<8x512xf32> to vector<8x256xf32>
    %103 = arith.mulf %101, %102 : vector<8x256xf32>
    %104 = arith.truncf %103 : vector<8x256xf32> to vector<8x256xbf16>
    %c0_41 = arith.constant 0 : index
    %c0_42 = arith.constant 0 : index
    %105 = vector.load %arg8[%c0_41, %c0_42] : memref<256x128xbf16, #tpu.memory_space<vmem>>, vector<256x128xbf16>
    %cst_43 = arith.constant dense<0.000000e+00> : vector<8x128xf32>
    %106 = tpu.matmul %104, %105, %cst_43 {dimension_numbers = #tpu.dot_dimension_numbers<[1], [0], [0], [1], [0, 0, 1, 1], [], []>} : vector<8x256xbf16>, vector<256x128xbf16>, vector<8x128xf32> -> vector<8x128xf32>
    %107 = arith.addf %71, %106 : vector<8x128xf32>
    %c0_44 = arith.constant 0 : index
    %c0_45 = arith.constant 0 : index
    %c0_46 = arith.constant 0 : index
    %108 = vector.load %arg9[%c0_44, %c0_45, %c0_46] : memref<1x8x128xf32, #tpu.memory_space<vmem>>, vector<1x8x128xf32>
    %109 = vector.shape_cast %108 : vector<1x8x128xf32> to vector<8x128xf32>
    %110 = vector.shape_cast %107 : vector<8x128xf32> to vector<1x8x128xf32>
    tpu.vector_store %arg9[%c0_44, %c0_45, %c0_46], %110 {strides = array<i32>} : memref<1x8x128xf32, #tpu.memory_space<vmem>>, vector<1x8x128xf32>,
    return
  }
  func.func @transform_0(%arg0: i32) -> (i32, i32, i32) {
    %c0_i32 = arith.constant 0 : i32
    %c0_i32_0 = arith.constant 0 : i32
    %c0_i32_1 = arith.constant 0 : i32
    return %arg0, %c0_i32, %c0_i32_0 : i32, i32, i32
  }
  func.func @transform_1(%arg0: i32) -> (i32, i32, i32, i32) {
    %c0_i32 = arith.constant 0 : i32
    %c0_i32_0 = arith.constant 0 : i32
    %c0_i32_1 = arith.constant 0 : i32
    %c0_i32_2 = arith.constant 0 : i32
    %c0_i32_3 = arith.constant 0 : i32
    return %c0_i32, %c0_i32_0, %c0_i32_1, %c0_i32_2 : i32, i32, i32, i32
  }
  func.func @transform_2(%arg0: i32) -> (i32, i32) {
    %c0_i32 = arith.constant 0 : i32
    %c0_i32_0 = arith.constant 0 : i32
    %c0_i32_1 = arith.constant 0 : i32
    return %c0_i32, %c0_i32_0 : i32, i32
  }
  func.func @transform_3(%arg0: i32) -> (i32, i32) {
    %c0_i32 = arith.constant 0 : i32
    %c0_i32_0 = arith.constant 0 : i32
    %c0_i32_1 = arith.constant 0 : i32
    return %c0_i32, %c0_i32_0 : i32, i32
  }
  func.func @transform_4(%arg0: i32) -> (i32, i32) {
    %c0_i32 = arith.constant 0 : i32
    %c0_i32_0 = arith.constant 0 : i32
    %c0_i32_1 = arith.constant 0 : i32
    return %c0_i32, %c0_i32_0 : i32, i32
  }
  func.func @transform_5(%arg0: i32) -> (i32, i32) {
    %c0_i32 = arith.constant 0 : i32
    %c0_i32_0 = arith.constant 0 : i32
    %c0_i32_1 = arith.constant 0 : i32
    return %c0_i32, %c0_i32_0 : i32, i32
  }
  func.func @transform_6(%arg0: i32) -> (i32, i32) {
    %c0_i32 = arith.constant 0 : i32
    %c0_i32_0 = arith.constant 0 : i32
    %c0_i32_1 = arith.constant 0 : i32
    return %c0_i32, %c0_i32_0 : i32, i32
  }
  func.func @transform_7(%arg0: i32) -> (i32, i32) {
    %c0_i32 = arith.constant 0 : i32
    %c0_i32_0 = arith.constant 0 : i32
    %c0_i32_1 = arith.constant 0 : i32
    return %c0_i32, %c0_i32_0 : i32, i32
  }
  func.func @transform_8(%arg0: i32) -> (i32, i32, i32) {
    %c0_i32 = arith.constant 0 : i32
    %c0_i32_0 = arith.constant 0 : i32
    %c0_i32_1 = arith.constant 0 : i32
    return %arg0, %c0_i32, %c0_i32_0 : i32, i32, i32
  }
}

</mosaic_0001>

<bundles_post_ra>
// kernel: t5_block_forward.1
= control target key start
LH: loop header
LB: loop body
LE: loop exit
PB: predicated region body
PF: predicated region fallthrough
CT: control target
= control target key end

     0   :  { %13 = vsyncpa [#allocation3], 0  ;;  %s3061_s0 = inlined_call_operand.hbm [shape: f32[2,8,128], index: 0, kind: input, shape index: {}]   ;;  %s3062_s1 = inlined_call_operand.hbm [shape: f32[1,2,8,8], index: 1, kind: input, shape index: {}]   ;;  %s3063_s2 = inlined_call_operand.vmem [shape: f32[1,128], index: 2, kind: input, shape index: {}]   ;;  %s3064_s3 = inlined_call_operand.hbm [shape: bf16[128,768], index: 3, kind: input, shape index: {}]   ;;  %s3065_s4 = inlined_call_operand.hbm [shape: bf16[256,128], index: 4, kind: input, shape index: {}]   ;;  %s3066_s5 = inlined_call_operand.vmem [shape: f32[1,128], index: 5, kind: input, shape index: {}]   ;;  %s3067_s6 = inlined_call_operand.hbm [shape: bf16[128,512], index: 6, kind: input, shape index: {}]   ;;  %s3068_s7 = inlined_call_operand.hbm [shape: bf16[256,128], index: 7, kind: input, shape index: {}]   ;;  %s3069_s8 = inlined_call_operand.hbm [shape: f32[2,8,128], index: 8, kind: output, shape index: {}]  }
   0x1   :  { %15 = vsyncpa [#allocation3 + $0x1], 0 }
   0x2   :  { %16 = vsyncpa [#allocation6], 0 }
   0x3   :  { %17 = vsyncpa [#allocation9], 0 }
   0x4   :  { %18 = vsyncpa [#allocation12], 0 }
   0x5   :  { %19 = vsyncpa [#allocation4], 0 }
   0x6   :  { %21 = vsyncpa [#allocation4 + $0x1], 0  ;;  %s2694_s27 = smov 0   ;;  %s2696_s28 = smov 0  }
   0x7   :  { %s2698_s29 = smov 0   ;;  %s2700_s30 = smov 0  }
   0x8 LB: > { %s2631_s9 = smov [#allocation5]   ;;  %s2715_s11 = sadd.s32 4294967295, %s2629_s30   ;;  %s2629_s30 = sphi %s2700_s30, %s3098_s30   ;;  %s2625_s29 = sphi %s2698_s29, %s3097_s29   ;;  %s2621_s28 = sphi %s2696_s28, %s3096_s28   ;;  %s2617_s27 = sphi %s2694_s27, %s3095_s27  }
   0x9   : > { %s243_s10 = sshll.u32 %s2631_s9, 4  ;;  %p1856_p0 = scmp.ge.s32.totalorder %s2629_s30, 1  ;;  %s2720_s10 = int_to_ptr.vmem [resolvable:$true] %s243_s10 }
   0xa   : > { %p3070_p1 = scmp.eq.s32.totalorder %s2715_s11, 0  ;;  %p231_p2 = scmp.lt.s32.totalorder %s2629_s30, 3 }
   0xb   : > { %s2632_s13 = smov [#allocation8]   ;;  %s2633_s16 = smov [#allocation7]  }
   0xc   : > { %p2722_p3 = pnand %p1856_p0, %p231_p2  ;;  %s272_s14 = sshll.u32 %s2632_s13, 4  ;;  %s2735_s14 = int_to_ptr.vmem [resolvable:$true] %s272_s14 }
   0xd   : > { %s2737_s17 = sshll.u32 %s2633_s16, 4  ;;  %s2381_s20 = scalar_lea.hbm %s3062_s1, 256  ;;  %s260_s17 = int_to_ptr.vmem [resolvable:$true] %s2737_s17 }
   0xe   : > { %s3075_s12 = scalar_select %p2722_p3, 1, 0 }
   0xf   : > { %p2129_p5 = pneg %p2722_p3  ;;  %p2382_p7 = scmp.ne.s32.totalorder %s3062_s1, %s2381_s20 }
  0x10   : > { %p2388_p11 = scmp.lt.u32.totalorder %s2381_s20, %s3062_s1 }
  0x11   : > { %p2731_p6 = pnand %p2129_p5, %p3070_p1 }
  0x13   : > { %p2747_p8 = pneg %p2731_p6 }
  0x15   : > { %p2384_p9 = pnand %p2747_p8, %p2382_p7 }
  0x17   : > { %p2385_p10 = pneg %p2384_p9 }
  0x19   : > { %p2390_p12 = pnand %p2388_p11, %p2385_p10 }
  0x1b   : > { %2393 = shalt.err (!%p2390_p12)
}
  0x1c   : > { %s2394_s26 = scalar_lea.vmem %s2720_s10, 256  ;;  %p2402_p5 = scmp.lt.s32.totalorder %s2720_s10, %s2720_s10 }
  0x1d   : > { %p2395_p13 = scmp.ne.s32.totalorder %s2720_s10, %s2394_s26  ;;  %p2403_p4 = scmp.lt.s32.totalorder %s2394_s26, %s2394_s26 }
  0x1f   : > { %p2397_p0 = pnand %p2395_p13, %p2747_p8  ;;  %p2404_p7 = por %p2403_p4, %p2402_p5 }
  0x21   : > { %p2398_p2 = pneg %p2397_p0 }
  0x23   : > { %p2405_p9 = pnand %p2404_p7, %p2398_p2 }
  0x25   : > { %2408 = shalt.err (!%p2405_p9)
}
  0x26   : > { %s2634_s9 = smov 128   ;;  %s2635_s13 = smov 8  }
  0x27   : > { %2132 = dma.hbm_to_vmem [thread:$0]  (!%p2731_p6), %s3062_s1, 256, %s2720_s10, [#allocation6], %s2634_s9, %s2634_s9, %s2635_s13  }
  0x28   : > { %s2409_s21 = scalar_lea.hbm %s3065_s4, 2048 }
  0x29   : > { %p2410_p4 = scmp.ne.s32.totalorder %s3065_s4, %s2409_s21  ;;  %p2416_p12 = scmp.lt.u32.totalorder %s2409_s21, %s3065_s4 }
  0x2b   : > { %p2412_p10 = pnand %p2410_p4, %p2747_p8 }
  0x2d   : > { %p2413_p11 = pneg %p2412_p10 }
  0x2f   : > { %p2418_p13 = pnand %p2416_p12, %p2413_p11 }
  0x31   : > { %2421 = shalt.err (!%p2418_p13)
}
  0x32   : > { %s2422_s10 = scalar_lea.vmem %s2735_s14, 2048  ;;  %p2430_p7 = scmp.lt.s32.totalorder %s2735_s14, %s2735_s14 }
  0x33   : > { %p2423_p0 = scmp.ne.s32.totalorder %s2735_s14, %s2422_s10  ;;  %p2431_p9 = scmp.lt.s32.totalorder %s2422_s10, %s2422_s10 }
  0x35   : > { %p2425_p2 = pnand %p2423_p0, %p2747_p8  ;;  %p2432_p4 = por %p2431_p9, %p2430_p7 }
  0x37   : > { %p2426_p5 = pneg %p2425_p2 }
  0x39   : > { %p2433_p10 = pnand %p2432_p4, %p2426_p5 }
  0x3b   : > { %2436 = shalt.err (!%p2433_p10)
}
  0x3c   : > { %s3072_s9 = smov 64   ;;  %s3073_s13 = smov 4  }
  0x3d   : > { %2138 = dma.hbm_to_vmem [thread:$0]  (!%p2731_p6), %s3065_s4, 2048, %s2735_s14, [#allocation9], %s3072_s9, %s3072_s9, %s3073_s13  }
  0x3e   : > { %s2437_s21 = scalar_lea.hbm %s3064_s3, 6144 }
  0x3f   : > { %p2438_p11 = scmp.ne.s32.totalorder %s3064_s3, %s2437_s21  ;;  %p2444_p0 = scmp.lt.u32.totalorder %s2437_s21, %s3064_s3 }
  0x41   : > { %p2440_p12 = pnand %p2438_p11, %p2747_p8 }
  0x43   : > { %p2441_p13 = pneg %p2440_p12 }
  0x45   : > { %p2446_p2 = pnand %p2444_p0, %p2441_p13 }
  0x47   : > { %2449 = shalt.err (!%p2446_p2)
}
  0x48   : > { %s2450_s10 = scalar_lea.vmem %s260_s17, 6144  ;;  %p2458_p4 = scmp.lt.s32.totalorder %s260_s17, %s260_s17 }
  0x49   : > { %p2451_p5 = scmp.ne.s32.totalorder %s260_s17, %s2450_s10  ;;  %p2459_p10 = scmp.lt.s32.totalorder %s2450_s10, %s2450_s10 }
  0x4b   : > { %p2453_p7 = pnand %p2451_p5, %p2747_p8  ;;  %p2460_p1 = por %p2459_p10, %p2458_p4 }
  0x4d   : > { %p2454_p9 = pneg %p2453_p7 }
  0x4f   : > { %p2461_p3 = pnand %p2460_p1, %p2454_p9 }
  0x51   : > { %2464 = shalt.err (!%p2461_p3)
}
  0x52   : > { %s2638_s14 = smov 384   ;;  %s2639_s16 = smov 24  }
  0x53   : > { %2135 = dma.hbm_to_vmem [thread:$0]  (!%p2731_p6), %s3064_s3, 6144, %s260_s17, [#allocation6], %s2638_s14, %s2638_s14, %s2639_s16  }
  0x54   : > { %s2640_s20 = smov [#allocation10]   ;;  %s2465_s25 = scalar_lea.hbm %s3067_s6, 4096 }
  0x55   : > { %s288_s21 = sshll.u32 %s2640_s20, 4  ;;  %p2466_p1 = scmp.ne.s32.totalorder %s3067_s6, %s2465_s25  ;;  %s289_s21 = int_to_ptr.vmem [resolvable:$true] %s288_s21 }
  0x56   : > { %p2472_p12 = scmp.lt.u32.totalorder %s2465_s25, %s3067_s6 }
  0x57   : > { %p2468_p3 = pnand %p2466_p1, %p2747_p8 }
  0x59   : > { %p2469_p11 = pneg %p2468_p3 }
  0x5b   : > { %p2474_p13 = pnand %p2472_p12, %p2469_p11 }
  0x5d   : > { %2477 = shalt.err (!%p2474_p13)
}
  0x5e   : > { %s2478_s17 = scalar_lea.vmem %s289_s21, 4096  ;;  %p2486_p7 = scmp.lt.s32.totalorder %s289_s21, %s289_s21 }
  0x5f   : > { %p2479_p0 = scmp.ne.s32.totalorder %s289_s21, %s2478_s17  ;;  %p2487_p9 = scmp.lt.s32.totalorder %s2478_s17, %s2478_s17 }
  0x61   : > { %p2481_p2 = pnand %p2479_p0, %p2747_p8  ;;  %p2488_p4 = por %p2487_p9, %p2486_p7 }
  0x63   : > { %p2482_p5 = pneg %p2481_p2 }
  0x65   : > { %p2489_p10 = pnand %p2488_p4, %p2482_p5 }
  0x67   : > { %2492 = shalt.err (!%p2489_p10)
}
  0x68   : > { %s2641_s14 = smov 256   ;;  %s2642_s16 = smov 16  }
  0x69   : > { %2141 = dma.hbm_to_vmem [thread:$0]  (!%p2731_p6), %s3067_s6, 4096, %s289_s21, [#allocation9], %s2641_s14, %s2641_s14, %s2642_s16  }
  0x6a   : > { %s2643_s18 = smov [#allocation11]   ;;  %s2493_s24 = scalar_lea.hbm %s3068_s7, 2048 }
  0x6b   : > { %s301_s19 = sshll.u32 %s2643_s18, 4  ;;  %p2494_p1 = scmp.ne.s32.totalorder %s3068_s7, %s2493_s24  ;;  %s302_s19 = int_to_ptr.vmem [resolvable:$true] %s301_s19 }
  0x6c   : > { %p2500_p12 = scmp.lt.u32.totalorder %s2493_s24, %s3068_s7 }
  0x6d   : > { %p2496_p3 = pnand %p2494_p1, %p2747_p8 }
  0x6f   : > { %p2497_p11 = pneg %p2496_p3 }
  0x71   : > { %p2502_p13 = pnand %p2500_p12, %p2497_p11 }
  0x73   : > { %2505 = shalt.err (!%p2502_p13)
}
  0x74   : > { %s2506_s21 = scalar_lea.vmem %s302_s19, 2048  ;;  %p2514_p7 = scmp.lt.s32.totalorder %s302_s19, %s302_s19 }
  0x75   : > { %p2507_p0 = scmp.ne.s32.totalorder %s302_s19, %s2506_s21  ;;  %p2515_p9 = scmp.lt.s32.totalorder %s2506_s21, %s2506_s21 }
  0x77   : > { %p2509_p2 = pnand %p2507_p0, %p2747_p8  ;;  %p2516_p4 = por %p2515_p9, %p2514_p7 }
  0x79   : > { %p2510_p5 = pneg %p2509_p2 }
  0x7b   : > { %p2517_p10 = pnand %p2516_p4, %p2510_p5 }
  0x7d   : > { %2520 = shalt.err (!%p2517_p10)
}
  0x7e   : > { %s3078_s14 = smov 4   ;;  %s3079_s16 = smov 64  }
  0x7f   : > { %2144 = dma.hbm_to_vmem [thread:$0]  (!%p2731_p6), %s3068_s7, 2048, %s302_s19, [#allocation12], %s3079_s16, %s3079_s16, %s3078_s14  }
  0x80   : > { %s1855_s15 = sadd.s32 4294967294, %s2629_s30   ;;  %s2854_s23 = sadd.s32 1, %s2629_s30  }
  0x81   : > { %s34_s18 = sadd.s32 1, %s2625_s29  ;;  %s31_s20 = ssub.s32 %s2629_s30, %s2854_s23 }
  0x82   : > { %p41_p8 = scmp.ne.s32.totalorder %s2625_s29, %s2621_s28  ;;  %p32_p1 = scmp.eq.s32.totalorder %s31_s20, 0 }
  0x83   : > { %p42_p3 = scmp.eq.s32.totalorder %s2629_s30, 0  ;;  %p47_p11 = scmp.ne.s32.totalorder %s2621_s28, %s2617_s27 }
  0x84   : > { %p218_p12 = scmp.eq.s32.totalorder %s2715_s11, 1  ;;  %p3080_p0 = scmp.eq.s32.totalorder %s2715_s11, 0 }
  0x85   : > { %s2866_s22 = scalar_select %p32_p1, %s2625_s29, %s34_s18  }
  0x86   : > { %p43_p13 = por %p42_p3, %p41_p8  ;;  %p2870_p2 = por %p3080_p0, %p47_p11 }
  0x87   : > { %p2874_p6 = por %p218_p12, %p41_p8  ;;  %p224_p5 = scmp.eq.s32.totalorder %s1855_s15, 1 }
  0x88   : > { %p2158_p7 = scmp.lt.s32.totalorder %s2629_s30, 2  ;;  %s315_s25 = sand.u32 1, %s2625_s29  }
  0x89   : > { %s3082_s19 = scalar_select %p2874_p6, 1, 0 }
  0x8a   : > { %p2880_p9 = por %p224_p5, %p47_p11  ;;  %s1863_s10 = sshll.u32 %s315_s25, 3 }
  0x8b   : > { %s1864_s17 = sshll.u32 %s2629_s30, 7  ;;  %s319_s9 = scalar_lea.vmem [#allocation2], %s1863_s10 }
  0x8c   : > { %s3083_s26 = scalar_select %p2880_p9, 1, 0 }
  0x8d   : > { %s2888_s16 = scalar_lea.hbm %s3061_s0, %s1864_s17  ;;  %s326_s13 = sshll.u32 %s319_s9, 4  ;;  %s2894_s13 = int_to_ptr.vmem [resolvable:$true] %s326_s13 }
  0x8e   : > { %p2890_p4 = pnand %p2158_p7, %p43_p13  ;;  %s316_s18 = scalar_lea.sflag [#allocation3], %s315_s25 }
  0x8f   : > { %s2521_s20 = scalar_lea.hbm %s2888_s16, 128  ;;  %s2526_s21 = scalar_lea.hbm %s3061_s0, 256 }
  0x90   : > { %p2522_p10 = scmp.ne.s32.totalorder %s2888_s16, %s2521_s20  ;;  %p2523_p8 = pneg %p2890_p4 }
  0x91   : > { %p2527_p11 = scmp.lt.u32.totalorder %s2888_s16, %s3061_s0  ;;  %p2528_p12 = scmp.lt.u32.totalorder %s2526_s21, %s2521_s20 }
  0x92   : > { %p2524_p1 = pnand %p2523_p8, %p2522_p10  ;;  %p2530_p0 = scmp.lt.u32.totalorder %s2521_s20, %s2888_s16 }
  0x93   : > { %p2529_p13 = por %p2528_p12, %p2527_p11 }
  0x94   : > { %p2525_p3 = pneg %p2524_p1 }
  0x95   : > { %p2531_p5 = por %p2530_p0, %p2529_p13 }
  0x97   : > { %p2532_p7 = pnand %p2531_p5, %p2525_p3 }
  0x99   : > { %2535 = shalt.err (!%p2532_p7)
}
  0x9a   : > { %s2536_s25 = scalar_lea.vmem %s2894_s13, 128  ;;  %s2644_s17 = smov [#allocation2]  }
  0x9b   : > { %p2537_p10 = scmp.ne.s32.totalorder %s2894_s13, %s2536_s25  ;;  %s2541_s10 = sshll.u32 %s2644_s17, 4  ;;  %s2542_s10 = int_to_ptr.vmem [resolvable:$false] %s2541_s10 }
  0x9c   : > { %s2543_s14 = scalar_lea.vmem %s2542_s10, 256  ;;  %p2544_p6 = scmp.lt.s32.totalorder %s2894_s13, %s2542_s10 }
  0x9d   : > { %p2539_p1 = pnand %p2537_p10, %p2523_p8  ;;  %p2545_p11 = scmp.lt.s32.totalorder %s2543_s14, %s2536_s25 }
  0x9f   : > { %p2540_p9 = pneg %p2539_p1  ;;  %p2546_p12 = por %p2545_p11, %p2544_p6 }
  0xa1   : > { %p2547_p13 = pnand %p2546_p12, %p2540_p9 }
  0xa3   : > { %2550 = shalt.err (!%p2547_p13)
}
  0xa4   : > { %2148 = dma.hbm_to_vmem [thread:$0]  (!%p2890_p4), %s2888_s16, 128, %s2894_s13, %s316_s18  }
  0xa5   : > { %p3085_p3 = scmp.ne.s32.totalorder %s3075_s12, 0 }
  0xa6   : > { %s2924_s20 = sand.u32 (!%p3085_p3), 1, %s2621_s28  }
  0xa7   : > { %335 = sbr.rel (%p3085_p3) target bundleno = 2708 (0xa94), region = 52  ;;  %s1866_s21 = sshll.u32 (!%p3085_p3), %s2924_s20, 3 }
  0xa8   : > { %s338_s9 = scalar_lea.sflag (!%p3085_p3), [#allocation3], %s2924_s20  ;;  %s341_s25 = scalar_lea.vmem (!%p3085_p3), [#allocation2], %s1866_s21 }
  0xae   : > { %2596 = dma.done.wait (%p2870_p2), %s338_s9, 128  }
  0xaf   : > { %2598 = vsyncadd (%p2870_p2), %s338_s9, 4294967168  ;;  %p3086_p6 = scmp.eq.s32.totalorder %s2715_s11, 0 }
  0xb1   : > { %2600 = dma.done.wait (%p3086_p6), [#allocation6], 6400   ;;  %p3087_p9 = pmov %p3086_p6 }
  0xb2   : > { %p3088_p4 = pmov %p3086_p6 }
  0xb3   : > { %2602 = vsyncadd (%p3087_p9), [#allocation6], 4294960896 }
  0xb4   : > { %2604 = dma.done.wait (%p3088_p4), [#allocation9], 6144   ;;  %p3089_p8 = pmov %p3088_p4 }
  0xb5   : > { %p3090_p0 = pmov %p3088_p4 }
  0xb6   : > { %2606 = vsyncadd (%p3089_p8), [#allocation9], 4294961152 }
  0xb7   : > { %2608 = dma.done.wait (%p3090_p0), [#allocation12], 2048   ;;  %p3091_p5 = pmov %p3090_p0 }
  0xb8   : > { %v2946_v0 = vld [vmem:[%s341_s25] sm:$0xff]  ;;  %v2222_v8 = vld [vmem:[#allocation7 + $0x3c] ss:$24 sps:$4 sm:$0xff]   ;;  %v2224_v9 = vld [vmem:[#allocation7 + $0x38] ss:$24 sps:$4 sm:$0xff]   ;;  %v2645_v32 = vmov 0  }
  0xb9   : > { %2610 = vsyncadd (%p3091_p5), [#allocation12], 4294965248  ;;  %v396_v1 = vmul.f32 %v2946_v0, %v2946_v0  ;;  %v2213_v2 = vld [vmem:[#allocation7 + $0x4] ss:$24 sps:$4 sm:$0xff]   ;;  %v2215_v3 = vld [vmem:[#allocation7] ss:$24 sps:$4 sm:$0xff]   ;;  %733 = vmatprep.mubr.bf16.mxu0 %v2645_v32  ;;  %774 = vmatprep.mubr.bf16.mxu1 %v2645_v32 }
  0xba   : > { %v2216_v4 = vld [vmem:[#allocation7 + $0xc] ss:$24 sps:$4 sm:$0xff]   ;;  %v2218_v5 = vld [vmem:[#allocation7 + $0x8] ss:$24 sps:$4 sm:$0xff]   ;;  %701 = vmatprep.subr.bf16.mxu0 %v2213_v2  ;;  %v2234_v16 = vld [vmem:[#allocation7 + $0x9c] ss:$24 sps:$4 sm:$0xff]  }
  0xbb   : > { %397 = vadd.xlane.f32.xlu0 %v396_v1  ;;  %v2219_v6 = vld [vmem:[#allocation7 + $0x34] ss:$24 sps:$4 sm:$0xff]   ;;  %702 = vmatpush1.bf16.msra.mxu0 %v2215_v3  ;;  %v2221_v7 = vld [vmem:[#allocation7 + $0x30] ss:$24 sps:$4 sm:$0xff]   ;;  %v2225_v10 = vld [vmem:[#allocation7 + $0x64] ss:$24 sps:$4 sm:$0xff]  }
  0xbc   : > { %742 = vmatprep.subr.bf16.mxu1 %v2216_v4  ;;  %703 = vmatprep.subr.bf16.mxu0 %v2219_v6  ;;  %v2227_v11 = vld [vmem:[#allocation7 + $0x60] ss:$24 sps:$4 sm:$0xff]   ;;  %v2228_v12 = vld [vmem:[#allocation7 + $0x6c] ss:$24 sps:$4 sm:$0xff]   ;;  %v2233_v15 = vld [vmem:[#allocation7 + $0x90] ss:$24 sps:$4 sm:$0xff]  }
  0xbd   : > { %743 = vmatpush1.bf16.msra.mxu1 %v2218_v5  ;;  %v2230_v13 = vld [vmem:[#allocation7 + $0x68] ss:$24 sps:$4 sm:$0xff]   ;;  %v2231_v14 = vld [vmem:[#allocation7 + $0x94] ss:$24 sps:$4 sm:$0xff]   ;;  %v2236_v17 = vld [vmem:[#allocation7 + $0x98] ss:$24 sps:$4 sm:$0xff]  }
  0xbe   : > { %744 = vmatprep.subr.bf16.mxu1 %v2222_v8  ;;  %v2237_v18 = vld [vmem:[#allocation7 + $0xc4] ss:$24 sps:$4 sm:$0xff]   ;;  %v2239_v19 = vld [vmem:[#allocation7 + $0xc0] ss:$24 sps:$4 sm:$0xff]   ;;  %v2243_v22 = vld [vmem:[#allocation7 + $0xf4] ss:$24 sps:$4 sm:$0xff]  }
  0xbf   : > { %704 = vmatpush1.bf16.msra.mxu0 %v2221_v7  ;;  %v2240_v20 = vld [vmem:[#allocation7 + $0xcc] ss:$24 sps:$4 sm:$0xff]   ;;  %v2242_v21 = vld [vmem:[#allocation7 + $0xc8] ss:$24 sps:$4 sm:$0xff]   ;;  %v2246_v24 = vld [vmem:[#allocation7 + $0xfc] ss:$24 sps:$4 sm:$0xff]  }
  0xc0   : > { %705 = vmatprep.subr.bf16.mxu0 %v2225_v10  ;;  %v2245_v23 = vld [vmem:[#allocation7 + $0xf0] ss:$24 sps:$4 sm:$0xff]   ;;  %v2249_v26 = vld [vmem:[#allocation7 + $0x124] ss:$24 sps:$4 sm:$0xff]   ;;  %v2251_v28 = vld [vmem:[#allocation7 + $0x120] ss:$24 sps:$4 sm:$0xff]  }
  0xc1   : > { %745 = vmatpush1.bf16.msra.mxu1 %v2224_v9  ;;  %v2248_v25 = vld [vmem:[#allocation7 + $0xf8] ss:$24 sps:$4 sm:$0xff]   ;;  %v2252_v27 = vld [vmem:[#allocation7 + $0x12c] ss:$24 sps:$4 sm:$0xff]   ;;  %v2254_v29 = vld [vmem:[#allocation7 + $0x128] ss:$24 sps:$4 sm:$0xff]  }
  0xc2   : > { %746 = vmatprep.subr.bf16.mxu1 %v2228_v12  ;;  %v2255_v30 = vld [vmem:[#allocation7 + $0x154] ss:$24 sps:$4 sm:$0xff]   ;;  %v2257_v33 = vld [vmem:[#allocation7 + $0x150] ss:$24 sps:$4 sm:$0xff]   ;;  %v1873_v40 = vld [vmem:[%s3063_s2] ss:$0 sm:$0xff] }
  0xc3   : > { %706 = vmatpush1.bf16.msra.mxu0 %v2227_v11  ;;  %v2258_v31 = vld [vmem:[#allocation7 + $0x15c] ss:$24 sps:$4 sm:$0xff]   ;;  %v2260_v34 = vld [vmem:[#allocation7 + $0x158] ss:$24 sps:$4 sm:$0xff]   ;;  %v2646_v59 = vmov 0.0   ;;  %vm2647_vm0 = vmmov 0  }
  0xc4   : > { %707 = vmatprep.subr.bf16.mxu0 %v2231_v14  ;;  %v2263_v35 = vld [vmem:[#allocation7 + $0x14] ss:$24 sps:$4 sm:$0xff]   ;;  %v2261_v43 = vld [vmem:[#allocation7 + $0x10] ss:$24 sps:$4 sm:$0xff]   ;;  %v2266_v45 = vld [vmem:[#allocation7 + $0x44] ss:$24 sps:$4 sm:$0xff]  }
  0xc5   : > { %747 = vmatpush1.bf16.msra.mxu1 %v2230_v13  ;;  %v2264_v46 = vld [vmem:[#allocation7 + $0x40] ss:$24 sps:$4 sm:$0xff]   ;;  %v2269_v47 = vld [vmem:[#allocation7 + $0x74] ss:$24 sps:$4 sm:$0xff]   ;;  %v2267_v48 = vld [vmem:[#allocation7 + $0x70] ss:$24 sps:$4 sm:$0xff]  }
  0xc6   : > { %748 = vmatprep.subr.bf16.mxu1 %v2234_v16  ;;  %v2272_v49 = vld [vmem:[#allocation7 + $0xa4] ss:$24 sps:$4 sm:$0xff]   ;;  %v2270_v50 = vld [vmem:[#allocation7 + $0xa0] ss:$24 sps:$4 sm:$0xff]   ;;  %v2275_v51 = vld [vmem:[#allocation7 + $0xd4] ss:$24 sps:$4 sm:$0xff]  }
  0xc7   : > { %708 = vmatpush1.bf16.msra.mxu0 %v2233_v15  ;;  %v2273_v52 = vld [vmem:[#allocation7 + $0xd0] ss:$24 sps:$4 sm:$0xff]   ;;  %v2278_v53 = vld [vmem:[#allocation7 + $0x104] ss:$24 sps:$4 sm:$0xff]   ;;  %v2276_v54 = vld [vmem:[#allocation7 + $0x100] ss:$24 sps:$4 sm:$0xff]  }
  0xc8   : > { %709 = vmatprep.subr.bf16.mxu0 %v2237_v18  ;;  %v2281_v55 = vld [vmem:[#allocation7 + $0x134] ss:$24 sps:$4 sm:$0xff]   ;;  %v2279_v56 = vld [vmem:[#allocation7 + $0x130] ss:$24 sps:$4 sm:$0xff]   ;;  %v2284_v57 = vld [vmem:[#allocation7 + $0x164] ss:$24 sps:$4 sm:$0xff]  }
  0xc9   : > { %749 = vmatpush1.bf16.msra.mxu1 %v2236_v17  ;;  %v2282_v58 = vld [vmem:[#allocation7 + $0x160] ss:$24 sps:$4 sm:$0xff]   ;;  %vm920_vm1 = vcmask 1043456   ;;  %v830_v15 = vld [vmem:[#allocation5] sm:$0xff]  ;;  %vm904_vm2 = vcmask 64512   ;;  %s1990_s15 = sshll.u32 %s2715_s11, 7 }
  0xca   : > { %750 = vmatprep.subr.bf16.mxu1 %v2240_v20  ;;  %s393_s18 = scalar_lea.vmem [#allocation13], %s1866_s21  ;;  %s3017_s9 = scalar_lea.hbm %s3069_s8, %s1990_s15 }
  0xcb   : > { %710 = vmatpush1.bf16.msra.mxu0 %v2239_v19  ;;  %s1737_s17 = sshll.u32 %s393_s18, 4  ;;  %s1724_s11 = scalar_lea.sflag [#allocation4], %s2924_s20  ;;  %s3019_s17 = int_to_ptr.vmem [resolvable:$true] %s1737_s17 }
  0xcc   : > { %711 = vmatprep.subr.bf16.mxu0 %v2243_v22  ;;  %s2551_s25 = scalar_lea.vmem %s3019_s17, 128  ;;  %p3092_p7 = scmp.ne.s32.totalorder %s3082_s19, 0 }
  0xcd   : > { %751 = vmatpush1.bf16.msra.mxu1 %v2242_v21  ;;  %p2552_p2 = scmp.ne.s32.totalorder %s3019_s17, %s2551_s25  ;;  %s2648_s21 = smov [#allocation13]  }
  0xce   : > { %752 = vmatprep.subr.bf16.mxu1 %v2246_v24  ;;  %s2555_s12 = sshll.u32 %s2648_s21, 4  ;;  %s2556_s12 = int_to_ptr.vmem [resolvable:$false] %s2555_s12 }
  0xcf   : > { %712 = vmatpush1.bf16.msra.mxu0 %v2245_v23  ;;  %p2553_p10 = pnand %p2552_p2, %p3092_p7  ;;  %s2557_s24 = scalar_lea.vmem %s2556_s12, 256 }
  0xd0   : > { %713 = vmatprep.subr.bf16.mxu0 %v2249_v26  ;;  %p2558_p11 = scmp.lt.s32.totalorder %s3019_s17, %s2556_s12  ;;  %p2559_p12 = scmp.lt.s32.totalorder %s2557_s24, %s2551_s25 }
  0xd1   : > { %753 = vmatpush1.bf16.msra.mxu1 %v2248_v25  ;;  %p2554_p1 = pneg %p2553_p10 }
  0xd2   : > { %754 = vmatprep.subr.bf16.mxu1 %v2252_v27  ;;  %p2560_p13 = por %p2559_p12, %p2558_p11 }
  0xd3   : > { %714 = vmatpush1.bf16.msra.mxu0 %v2251_v28 }
  0xd4   : > { %715 = vmatprep.subr.bf16.mxu0 %v2255_v30  ;;  %p2561_p3 = pnand %p2560_p13, %p2554_p1 }
  0xd5   : > { %755 = vmatpush1.bf16.msra.mxu1 %v2254_v29 }
  0xd6   : > { %756 = vmatprep.subr.bf16.mxu1 %v2258_v31 }
  0xd7   : > { %716 = vmatpush1.bf16.msra.mxu0 %v2257_v33 }
  0xd8   : > { %783 = vmatprep.subr.bf16.mxu0 %v2263_v35 }
  0xd9   : > { %757 = vmatpush1.bf16.msra.mxu1 %v2260_v34 }
  0xda   : > { %2041 = vmatprep.subr.bf16.mxu1 %v2646_v59 }
 0x148   : > { %v398_v36 = vpop.xlane.xlu0 %397 }
 0x149   : > { %v400_v37 = vmul.f32 0.0078125, %v398_v36 }
 0x14b   : > { %v402_v38 = vadd.f32 1e-06, %v400_v37 }
 0x14d   : > { %2365 = vrsqrt.f32 %v402_v38  ;;  %v831_v38 = vld [vmem:[#allocation5 + $0x8] sm:$0xff] }
 0x157   : > { %v2366_v39 = vpop.eup %2365 }
 0x158   : > { %v404_v41 = vmul.f32 %v2366_v39, %v2946_v0 }
 0x15a   : > { %v411_v42 = vmul.f32 %v1873_v40, %v404_v41 }
 0x15c   : > { %v412_v44 = vpack.c.bf16 %v411_v42, %v411_v42 }
 0x15e   : > { %734 = vmatmul.mubr.bf16.vlgmr.msra.gmra.mrb[0].mxu0 %v412_v44  ;;  %775 = vmatmul.mubr.bf16.vlgmr.msra.gmra.mrb[0].mxu1 %v412_v44 }
 0x15f   : > { %784 = vmatpush1.bf16.msra.mxu0 %v2261_v43  ;;  %815 = vmatprep.mubr.bf16.mxu0 %v2645_v32 }
 0x160   : > { %785 = vmatprep.subr.bf16.mxu0 %v2266_v45  ;;  %2043 = vmatprep.mubr.msk.bf16.mxu1 %vm2647_vm0, %v2646_v59 }
 0x163   : > { %786 = vmatpush1.bf16.msra.mxu0 %v2264_v46 }
 0x164   : > { %787 = vmatprep.subr.bf16.mxu0 %v2269_v47 }
 0x167   : > { %788 = vmatpush1.bf16.msra.mxu0 %v2267_v48 }
 0x168   : > { %789 = vmatprep.subr.bf16.mxu0 %v2272_v49 }
 0x16b   : > { %790 = vmatpush1.bf16.msra.mxu0 %v2270_v50  ;;  %v2293_v50 = vld [vmem:[#allocation8 + $0x40] sm:$0xff]  }
 0x16c   : > { %791 = vmatprep.subr.bf16.mxu0 %v2275_v51  ;;  %v2294_v51 = vld [vmem:[#allocation8 + $0x48] sm:$0xff]  }
 0x16f   : > { %792 = vmatpush1.bf16.msra.mxu0 %v2273_v52  ;;  %v2295_v52 = vld [vmem:[#allocation8 + $0x50] sm:$0xff]  }
 0x170   : > { %793 = vmatprep.subr.bf16.mxu0 %v2278_v53  ;;  %v2296_v53 = vld [vmem:[#allocation8 + $0x58] sm:$0xff]  }
 0x173   : > { %794 = vmatpush1.bf16.msra.mxu0 %v2276_v54  ;;  %v2297_v54 = vld [vmem:[#allocation8 + $0x60] sm:$0xff]  }
 0x174   : > { %795 = vmatprep.subr.bf16.mxu0 %v2281_v55  ;;  %v2298_v55 = vld [vmem:[#allocation8 + $0x68] sm:$0xff]  }
 0x177   : > { %796 = vmatpush1.bf16.msra.mxu0 %v2279_v56  ;;  %v2299_v56 = vld [vmem:[#allocation8 + $0x70] sm:$0xff]  }
 0x178   : > { %797 = vmatprep.subr.bf16.mxu0 %v2284_v57 }
 0x17b   : > { %798 = vmatpush1.bf16.msra.mxu0 %v2282_v58 }
 0x17c   : > { %2065 = vmatprep.subr.bf16.mxu0 %v2646_v59 }
 0x17e   : > { %816 = vmatmul.mubr.bf16.vlgmr.msra.gmra.mrb[4].mxu0 %v412_v44 }
 0x17f   : > { %2081 = vmatprep.mubr.msk.bf16.mxu0 %vm2647_vm0, %v2646_v59  ;;  %2066 = vmatpush3.bf16.msra.mxu0 %v2293_v50  ;;  %v2340_v50 = vld [vmem:[#allocation10 + $0xc8] ss:$16 sps:$4 sm:$0xff]  }
 0x180   : > { %2067 = vmatprep.subr.bf16.mxu0 %v2646_v59 }
 0x183   : > { %2068 = vmatpush3.bf16.msra.mxu0 %v2294_v51  ;;  %v2345_v51 = vld [vmem:[#allocation10 + $0xe4] ss:$16 sps:$4 sm:$0xff]  }
 0x184   : > { %2069 = vmatprep.subr.bf16.mxu0 %v2646_v59 }
 0x187   : > { %2070 = vmatpush3.bf16.msra.mxu0 %v2295_v52  ;;  %v2348_v52 = vld [vmem:[#allocation10 + $0xec] ss:$16 sps:$4 sm:$0xff]  }
 0x188   : > { %2071 = vmatprep.subr.bf16.mxu0 %v2646_v59 }
 0x18b   : > { %2072 = vmatpush3.bf16.msra.mxu0 %v2296_v53  ;;  %v2343_v53 = vld [vmem:[#allocation10 + $0xe0] ss:$16 sps:$4 sm:$0xff]  }
 0x18c   : > { %2073 = vmatprep.subr.bf16.mxu0 %v2646_v59 }
 0x18f   : > { %2074 = vmatpush3.bf16.msra.mxu0 %v2297_v54  ;;  %v2346_v54 = vld [vmem:[#allocation10 + $0xe8] ss:$16 sps:$4 sm:$0xff]  }
 0x190   : > { %2075 = vmatprep.subr.bf16.mxu0 %v2646_v59 }
 0x193   : > { %2076 = vmatpush3.bf16.msra.mxu0 %v2298_v55 }
 0x194   : > { %2077 = vmatprep.subr.bf16.mxu0 %v2646_v59 }
 0x197   : > { %2078 = vmatpush3.bf16.msra.mxu0 %v2299_v56 }
 0x198   : > { %2079 = vmatprep.subr.bf16.mxu0 %v2646_v59 }
 0x231   : > { %v735_v60 = vpop.f32.mrb[0].mxu0  ;;  %v776_v61 = vpop.f32.mrb[0].mxu1 }
 0x232   : > { %v826_v62 = vpack.c.bf16 %v776_v61, %v776_v61  ;;  %v737_v63 = vpop.f32.mrb[1].mxu0  ;;  %v778_v1 = vpop.f32.mrb[1].mxu1  ;;  %v824_v6 = vpack.c.bf16 %v735_v60, %v735_v60  ;;  %v2285_v61 = vld [vmem:[#allocation8] sm:$0xff]  }
 0x233   : > { %v739_v2 = vpop.f32.mrb[2].mxu0  ;;  %v780_v3 = vpop.f32.mrb[2].mxu1  ;;  %v827_v31 = vpack.c.bf16 %v778_v1, %v778_v1  ;;  %v825_v33 = vpack.c.bf16 %v737_v63, %v737_v63  ;;  %v2286_v63 = vld [vmem:[#allocation8 + $0x8] sm:$0xff]   ;;  %v2287_v1 = vld [vmem:[#allocation8 + $0x10] sm:$0xff]  }
 0x234   : > { %v740_v4 = vpop.f32.mrb[3].mxu0  ;;  %v781_v5 = vpop.f32.mrb[3].mxu1  ;;  %2042 = vmatpush3.bf16.xpose.msra.mxu1 %v826_v62  ;;  %v2288_v2 = vld [vmem:[#allocation8 + $0x18] sm:$0xff]   ;;  %v2289_v3 = vld [vmem:[#allocation8 + $0x20] sm:$0xff]  }
 0x235   : > { %2047 = vmatprep.subr.bf16.mxu1 %v2646_v59  ;;  %v2290_v4 = vld [vmem:[#allocation8 + $0x28] sm:$0xff]   ;;  %v2291_v5 = vld [vmem:[#allocation8 + $0x30] sm:$0xff]  }
 0x23b   : > { %2044 = vmatmul.mubr.bf16.vlgmr.msra.gmra.mrb[4].mxu1 %v824_v6  ;;  %v2292_v6 = vld [vmem:[#allocation8 + $0x38] sm:$0xff]  }
 0x23c   : > { %2049 = vmatprep.mubr.msk.bf16.mxu1 %vm2647_vm0, %v2646_v59 }
 0x251   : > { %v817_v7 = vpop.f32.mrb[4].mxu0 }
 0x252   : > { %v828_v8 = vpack.c.bf16 %v817_v7, %v817_v7  ;;  %v819_v9 = vpop.f32.mrb[5].mxu0 }
 0x253   : > { %v829_v10 = vpack.c.bf16 %v819_v9, %v819_v9  ;;  %v821_v11 = vpop.f32.mrb[6].mxu0 }
 0x254   : > { %v922_v12 = vsel %vm920_vm1, %v828_v8, 0  ;;  %v822_v13 = vpop.f32.mrb[7].mxu0  ;;  %v2300_v8 = vld [vmem:[#allocation8 + $0x78] sm:$0xff]  }
 0x255   : > { %v1021_v14 = vsel %vm920_vm1, %v829_v10, 0  ;;  %2048 = vmatpush3.bf16.msra.mxu1 %v922_v12  ;;  %2080 = vmatpush3.bf16.msra.mxu0 %v2300_v8  ;;  %v2356_v8 = vld [vmem:[#allocation11 + $0x18] sm:$0xff]  }
 0x256   : > { %2053 = vmatprep.subr.bf16.mxu1 %v2646_v59 }
 0x30e   : > { %v898_v16 = vpop.f32.mrb[4].mxu1 }
 0x30f   : > { %v899_v17 = vadd.f32 %v898_v16, %v830_v15  ;;  %v2045_v18 = vpop.f32.mrb[5].mxu1 }
 0x310   : > { %v901_v19 = vpop.f32.mrb[6].mxu1  ;;  %v2303_v18 = vld [vmem:[#allocation10 + $0x4] ss:$16 sps:$4 sm:$0xff]  }
 0x311   : > { %v2046_v20 = vpop.f32.mrb[7].mxu1  ;;  %v905_v21 = vsel %vm904_vm2, %v899_v17, -inf  ;;  %v2304_v19 = vld [vmem:[#allocation10 + $0x8] ss:$16 sps:$4 sm:$0xff]   ;;  %1449 = vmatprep.subr.bf16.mxu0 %v2303_v18 }
 0x312   : > { %906 = vmax.xlane.f32.xlu0 %v905_v21  ;;  %v2306_v20 = vld [vmem:[#allocation10 + $0xc] ss:$16 sps:$4 sm:$0xff]   ;;  %v2309_v21 = vld [vmem:[#allocation10 + $0x24] ss:$16 sps:$4 sm:$0xff]  }
 0x39f   : > { %v907_v22 = vpop.xlane.xlu0 %906 }
 0x3a0   : > { %v908_v23 = vsub.f32 %v899_v17, %v907_v22  ;;  %v2301_v17 = vld [vmem:[#allocation10] ss:$16 sps:$4 sm:$0xff]   ;;  %v2312_v22 = vld [vmem:[#allocation10 + $0x2c] ss:$16 sps:$4 sm:$0xff]  }
 0x3a2   : > { %v909_v24 = vmul.f32 1.442695, %v908_v23  ;;  %v2307_v23 = vld [vmem:[#allocation10 + $0x20] ss:$16 sps:$4 sm:$0xff]  }
 0x3a4   : > { %2367 = vpow2.f32 %v909_v24  ;;  %v2310_v24 = vld [vmem:[#allocation10 + $0x28] ss:$16 sps:$4 sm:$0xff]  }
 0x3ae   : > { %v2368_v25 = vpop.eup %2367 }
 0x3af   : > { %v911_v26 = vsel %vm904_vm2, %v2368_v25, 0.0 }
 0x3b0   : > { %912 = vadd.xlane.f32.xlu1 %v911_v26  ;;  %v2313_v26 = vld [vmem:[#allocation10 + $0x40] ss:$16 sps:$4 sm:$0xff]  }
 0x43d   : > { %v913_v27 = vpop.xlane.xlu1 %912 }
 0x43e   : > { %2369 = vrcp.f32 %v913_v27  ;;  %v2316_v27 = vld [vmem:[#allocation10 + $0x48] ss:$16 sps:$4 sm:$0xff]  }
 0x448   : > { %v2370_v28 = vpop.eup %2369 }
 0x449   : > { %v915_v29 = vmul.f32 %v2370_v28, %v2368_v25  ;;  %v2315_v25 = vld [vmem:[#allocation10 + $0x44] ss:$16 sps:$4 sm:$0xff]  }
 0x44b   : > { %v916_v30 = vpack.c.bf16 %v915_v29, %v915_v29 }
 0x44d   : > { %2050 = vmatmul.mubr.msk.bf16.vlgmr.msra.gmra.mrb[8].mxu1 %vm904_vm2, %v916_v30 }
 0x44e   : > { %2054 = vmatpush3.bf16.xpose.msra.mxu1 %v827_v31  ;;  %2055 = vmatprep.mubr.msk.bf16.mxu1 %vm2647_vm0, %v2646_v59 }
 0x44f   : > { %2059 = vmatprep.subr.bf16.mxu1 %v2646_v59 }
 0x455   : > { %2056 = vmatmul.mubr.bf16.vlgmr.msra.gmra.mrb[12].mxu1 %v825_v33 }
 0x456   : > { %2060 = vmatpush3.bf16.msra.mxu1 %v1021_v14  ;;  %2061 = vmatprep.mubr.msk.bf16.mxu1 %vm2647_vm0, %v2646_v59 }
 0x457   : > { %2085 = vmatprep.subr.bf16.mxu1 %v2646_v59 }
 0x520   : > { %v2976_v34 = vpop.f32.mrb[8].mxu1 }
 0x521   : > { %v2051_v35 = vpop.f32.mrb[9].mxu1  ;;  %v964_v7 = vpack.c.bf16 %v2976_v34, %v2976_v34 }
 0x522   : > { %v961_v36 = vpop.f32.mrb[10].mxu1 }
 0x523   : > { %v2052_v37 = vpop.f32.mrb[11].mxu1  ;;  %v2321_v36 = vld [vmem:[#allocation10 + $0x64] ss:$16 sps:$4 sm:$0xff]  }
 0x524   : > { %v2324_v37 = vld [vmem:[#allocation10 + $0x6c] ss:$16 sps:$4 sm:$0xff]  }
 0x528   : > { %v999_v39 = vpop.f32.mrb[12].mxu1 }
 0x529   : > { %v1000_v40 = vadd.f32 %v999_v39, %v831_v38  ;;  %v2057_v41 = vpop.f32.mrb[13].mxu1  ;;  %v2319_v38 = vld [vmem:[#allocation10 + $0x60] ss:$16 sps:$4 sm:$0xff]   ;;  %v2322_v39 = vld [vmem:[#allocation10 + $0x68] ss:$16 sps:$4 sm:$0xff]  }
 0x52a   : > { %v1002_v42 = vpop.f32.mrb[14].mxu1  ;;  %v2327_v41 = vld [vmem:[#allocation10 + $0x84] ss:$16 sps:$4 sm:$0xff]  }
 0x52b   : > { %v2058_v43 = vpop.f32.mrb[15].mxu1  ;;  %v1005_v44 = vsel %vm904_vm2, %v1000_v40, -inf  ;;  %v2328_v42 = vld [vmem:[#allocation10 + $0x88] ss:$16 sps:$4 sm:$0xff]  }
 0x52c   : > { %1006 = vmax.xlane.f32.xlu1 %v1005_v44  ;;  %v2330_v43 = vld [vmem:[#allocation10 + $0x8c] ss:$16 sps:$4 sm:$0xff]   ;;  %v2333_v44 = vld [vmem:[#allocation10 + $0xa4] ss:$16 sps:$4 sm:$0xff]  }
 0x5b9   : > { %v1007_v45 = vpop.xlane.xlu1 %1006 }
 0x5ba   : > { %v1008_v46 = vsub.f32 %v1000_v40, %v1007_v45  ;;  %v2325_v40 = vld [vmem:[#allocation10 + $0x80] ss:$16 sps:$4 sm:$0xff]  }
 0x5bb   : > { %v2331_v45 = vld [vmem:[#allocation10 + $0xa0] ss:$16 sps:$4 sm:$0xff]  }
 0x5bc   : > { %v1009_v47 = vmul.f32 1.442695, %v1008_v46  ;;  %v2334_v46 = vld [vmem:[#allocation10 + $0xa8] ss:$16 sps:$4 sm:$0xff]  }
 0x5be   : > { %2371 = vpow2.f32 %v1009_v47  ;;  %v2339_v47 = vld [vmem:[#allocation10 + $0xc4] ss:$16 sps:$4 sm:$0xff]  }
 0x5c8   : > { %v2372_v48 = vpop.eup %2371 }
 0x5c9   : > { %v1011_v49 = vsel %vm904_vm2, %v2372_v48, 0.0 }
 0x5ca   : > { %1012 = vadd.xlane.f32.xlu0 %v1011_v49  ;;  %v2337_v49 = vld [vmem:[#allocation10 + $0xc0] ss:$16 sps:$4 sm:$0xff]  }
 0x657   : > { %v1013_v57 = vpop.xlane.xlu0 %1012 }
 0x658   : > { %2373 = vrcp.f32 %v1013_v57 }
 0x662   : > { %v2374_v58 = vpop.eup %2373 }
 0x663   : > { %v1015_v60 = vmul.f32 %v2374_v58, %v2372_v48  ;;  %v2342_v48 = vld [vmem:[#allocation10 + $0xcc] ss:$16 sps:$4 sm:$0xff]  }
 0x665   : > { %v1016_v62 = vpack.c.bf16 %v1015_v60, %v1015_v60  ;;  %v1940_v60 = vld [vmem:[%s3066_s5] ss:$0 sm:$0xff] }
 0x667   : > { %2062 = vmatmul.mubr.msk.bf16.vlgmr.msra.gmra.mrb[16].mxu1 %vm904_vm2, %v1016_v62 }
 0x668   : > { %2086 = vmatpush3.bf16.msra.mxu1 %v2285_v61  ;;  %2101 = vmatprep.mubr.msk.bf16.mxu1 %vm2647_vm0, %v2646_v59 }
 0x669   : > { %2087 = vmatprep.subr.bf16.mxu1 %v2646_v59 }
 0x66c   : > { %2088 = vmatpush3.bf16.msra.mxu1 %v2286_v63 }
 0x66d   : > { %2089 = vmatprep.subr.bf16.mxu1 %v2646_v59 }
 0x670   : > { %2090 = vmatpush3.bf16.msra.mxu1 %v2287_v1  ;;  %v2349_v1 = vld [vmem:[#allocation11 + $0x40] sm:$0xff]  }
 0x671   : > { %2091 = vmatprep.subr.bf16.mxu1 %v2646_v59 }
 0x674   : > { %2092 = vmatpush3.bf16.msra.mxu1 %v2288_v2  ;;  %v2350_v2 = vld [vmem:[#allocation11] sm:$0xff]  }
 0x675   : > { %2093 = vmatprep.subr.bf16.mxu1 %v2646_v59 }
 0x678   : > { %2094 = vmatpush3.bf16.msra.mxu1 %v2289_v3  ;;  %v2351_v3 = vld [vmem:[#allocation11 + $0x48] sm:$0xff]  }
 0x679   : > { %2095 = vmatprep.subr.bf16.mxu1 %v2646_v59 }
 0x67c   : > { %2096 = vmatpush3.bf16.msra.mxu1 %v2290_v4  ;;  %v2352_v4 = vld [vmem:[#allocation11 + $0x8] sm:$0xff]  }
 0x67d   : > { %2097 = vmatprep.subr.bf16.mxu1 %v2646_v59 }
 0x680   : > { %2098 = vmatpush3.bf16.msra.mxu1 %v2291_v5  ;;  %v2353_v5 = vld [vmem:[#allocation11 + $0x50] sm:$0xff]  }
 0x681   : > { %2099 = vmatprep.subr.bf16.mxu1 %v2646_v59 }
 0x684   : > { %2100 = vmatpush3.bf16.msra.mxu1 %v2292_v6  ;;  %v2354_v6 = vld [vmem:[#allocation11 + $0x10] sm:$0xff]  }
 0x685   : > { %1490 = vmatprep.subr.bf16.mxu1 %v2306_v20 }
 0x687   : > { %2102 = vmatmul.mubr.bf16.vlgmr.msra.gmra.mrb[20].mxu1 %v964_v7  ;;  %v2355_v7 = vld [vmem:[#allocation11 + $0x58] sm:$0xff]  }
 0x688   : > { %1522 = vmatprep.mubr.bf16.mxu1 %v2645_v32  ;;  %1491 = vmatpush1.bf16.msra.mxu1 %v2304_v19 }
 0x689   : > { %1492 = vmatprep.subr.bf16.mxu1 %v2312_v22 }
 0x68c   : > { %1493 = vmatpush1.bf16.msra.mxu1 %v2310_v24 }
 0x73a   : > { %v1057_v9 = vpop.f32.mrb[16].mxu1 }
 0x73b   : > { %v1063_v10 = vpack.c.bf16 %v1057_v9, %v1057_v9  ;;  %v2063_v11 = vpop.f32.mrb[17].mxu1  ;;  %v2357_v9 = vld [vmem:[#allocation11 + $0x60] sm:$0xff]  }
 0x73c   : > { %v1060_v12 = vpop.f32.mrb[18].mxu1  ;;  %v2359_v11 = vld [vmem:[#allocation11 + $0x68] sm:$0xff]  }
 0x73d   : > { %v2064_v13 = vpop.f32.mrb[19].mxu1  ;;  %2082 = vmatmul.mubr.bf16.vlgmr.msra.gmra.mrb[8].mxu0 %v1063_v10  ;;  %v2358_v10 = vld [vmem:[#allocation11 + $0x20] sm:$0xff]   ;;  %v2360_v12 = vld [vmem:[#allocation11 + $0x28] sm:$0xff]  }
 0x73e   : > { %1481 = vmatprep.mubr.bf16.mxu0 %v2645_v32  ;;  %1450 = vmatpush1.bf16.msra.mxu0 %v2301_v17  ;;  %v2318_v32 = vld [vmem:[#allocation10 + $0x4c] ss:$16 sps:$4 sm:$0xff]   ;;  %v2361_v13 = vld [vmem:[#allocation11 + $0x70] sm:$0xff]  }
 0x73f   : > { %1451 = vmatprep.subr.bf16.mxu0 %v2309_v21  ;;  %1494 = vmatprep.subr.bf16.mxu1 %v2318_v32 }
 0x740   : > { %1495 = vmatpush1.bf16.msra.mxu1 %v2316_v27 }
 0x741   : > { %1496 = vmatprep.subr.bf16.mxu1 %v2324_v37 }
 0x742   : > { %1452 = vmatpush1.bf16.msra.mxu0 %v2307_v23 }
 0x743   : > { %1453 = vmatprep.subr.bf16.mxu0 %v2315_v25 }
 0x744   : > { %1497 = vmatpush1.bf16.msra.mxu1 %v2322_v39 }
 0x745   : > { %1498 = vmatprep.subr.bf16.mxu1 %v2330_v43 }
 0x746   : > { %1454 = vmatpush1.bf16.msra.mxu0 %v2313_v26 }
 0x747   : > { %1455 = vmatprep.subr.bf16.mxu0 %v2321_v36 }
 0x748   : > { %1499 = vmatpush1.bf16.msra.mxu1 %v2328_v42 }
 0x74a   : > { %1456 = vmatpush1.bf16.msra.mxu0 %v2319_v38 }
 0x74b   : > { %1457 = vmatprep.subr.bf16.mxu0 %v2327_v41 }
 0x74e   : > { %1458 = vmatpush1.bf16.msra.mxu0 %v2325_v40 }
 0x74f   : > { %1459 = vmatprep.subr.bf16.mxu0 %v2333_v44 }
 0x752   : > { %1460 = vmatpush1.bf16.msra.mxu0 %v2331_v45 }
 0x753   : > { %1461 = vmatprep.subr.bf16.mxu0 %v2339_v47 }
 0x756   : > { %1462 = vmatpush1.bf16.msra.mxu0 %v2337_v49 }
 0x757   : > { %1463 = vmatprep.subr.bf16.mxu0 %v2345_v51 }
 0x75a   : > { %v1234_v14 = vpop.f32.mrb[20].mxu1  ;;  %1464 = vmatpush1.bf16.msra.mxu0 %v2343_v53 }
 0x75b   : > { %v2103_v15 = vpop.f32.mrb[21].mxu1  ;;  %2019 = vmatprep.subr.bf16.mxu0 %v2349_v1 }
 0x75c   : > { %v1237_v59 = vpop.f32.mrb[22].mxu1  ;;  %v2363_v15 = vld [vmem:[#allocation11 + $0x78] sm:$0xff]  }
 0x75d   : > { %v2104_v16 = vpop.f32.mrb[23].mxu1  ;;  %v2364_v59 = vld [vmem:[#allocation11 + $0x38] sm:$0xff]  }
 0x810   : > { %v1146_v28 = vpop.f32.mrb[8].mxu0 }
 0x811   : > { %v1235_v29 = vadd.f32 %v1234_v14, %v1146_v28  ;;  %v2083_v30 = vpop.f32.mrb[9].mxu0  ;;  %v2362_v14 = vld [vmem:[#allocation11 + $0x30] sm:$0xff]  }
 0x812   : > { %v1149_v31 = vpop.f32.mrb[10].mxu0 }
 0x813   : > { %v3002_v33 = vadd.f32 %v1235_v29, %v2946_v0  ;;  %v2084_v34 = vpop.f32.mrb[11].mxu0  ;;  %v2336_v0 = vld [vmem:[#allocation10 + $0xac] ss:$16 sps:$4 sm:$0xff]  }
 0x814   : > { %1500 = vmatprep.subr.bf16.mxu1 %v2336_v0 }
 0x815   : > { %v1241_v35 = vmul.f32 %v3002_v33, %v3002_v33  ;;  %1501 = vmatpush1.bf16.msra.mxu1 %v2334_v46 }
 0x816   : > { %1502 = vmatprep.subr.bf16.mxu1 %v2342_v48 }
 0x817   : > { %1242 = vadd.xlane.f32.xlu1 %v1241_v35 }
 0x819   : > { %1503 = vmatpush1.bf16.msra.mxu1 %v2340_v50 }
 0x81a   : > { %1504 = vmatprep.subr.bf16.mxu1 %v2348_v52 }
 0x81d   : > { %1505 = vmatpush1.bf16.msra.mxu1 %v2346_v54 }
 0x8a4   : > { %v1243_v55 = vpop.xlane.xlu1 %1242 }
 0x8a5   : > { %v1244_v56 = vmul.f32 0.0078125, %v1243_v55 }
 0x8a7   : > { %v1246_v57 = vadd.f32 1e-06, %v1244_v56 }
 0x8a9   : > { %2375 = vrsqrt.f32 %v1246_v57 }
 0x8b3   : > { %v2376_v58 = vpop.eup %2375 }
 0x8b4   : > { %v1248_v61 = vmul.f32 %v2376_v58, %v3002_v33 }
 0x8b6   : > { %v1255_v62 = vmul.f32 %v1940_v60, %v1248_v61 }
 0x8b8   : > { %v1256_v63 = vpack.c.bf16 %v1255_v62, %v1255_v62 }
 0x8ba   : > { %1482 = vmatmul.mubr.bf16.vlgmr.msra.gmra.mrb[12].mxu0 %v1256_v63  ;;  %1523 = vmatmul.mubr.bf16.vlgmr.msra.gmra.mrb[24].mxu1 %v1256_v63 }
 0x8bb   : > { %2020 = vmatpush3.bf16.msra.mxu0 %v2350_v2 }
 0x8bc   : > { %2021 = vmatprep.subr.bf16.mxu0 %v2351_v3 }
 0x8bf   : > { %2022 = vmatpush3.bf16.msra.mxu0 %v2352_v4 }
 0x8c0   : > { %2023 = vmatprep.subr.bf16.mxu0 %v2353_v5 }
 0x8c3   : > { %2024 = vmatpush3.bf16.msra.mxu0 %v2354_v6 }
 0x8c4   : > { %2025 = vmatprep.subr.bf16.mxu0 %v2355_v7 }
 0x8c7   : > { %2026 = vmatpush3.bf16.msra.mxu0 %v2356_v8 }
 0x8c8   : > { %2027 = vmatprep.subr.bf16.mxu0 %v2357_v9 }
 0x8cb   : > { %2028 = vmatpush3.bf16.msra.mxu0 %v2358_v10 }
 0x8cc   : > { %2029 = vmatprep.subr.bf16.mxu0 %v2359_v11 }
 0x8cf   : > { %2030 = vmatpush3.bf16.msra.mxu0 %v2360_v12 }
 0x8d0   : > { %2031 = vmatprep.subr.bf16.mxu0 %v2361_v13 }
 0x8d3   : > { %2032 = vmatpush3.bf16.msra.mxu0 %v2362_v14 }
 0x8d4   : > { %2033 = vmatprep.subr.bf16.mxu0 %v2363_v15 }
 0x8d7   : > { %2034 = vmatpush3.bf16.msra.mxu0 %v2364_v59 }
 0x98d   : > { %v1483_v16 = vpop.f32.mrb[12].mxu0  ;;  %v1524_v17 = vpop.f32.mrb[24].mxu1 }
 0x98e   : > { %v1533_v18 = vmul.f32 0.044715, %v1483_v16  ;;  %v1485_v19 = vpop.f32.mrb[13].mxu0  ;;  %v1526_v20 = vpop.f32.mrb[25].mxu1  ;;  %v1531_v37 = vmul.f32 0.5, %v1483_v16 }
 0x98f   : > { %v1534_v21 = vmul.f32 0.044715, %v1485_v19  ;;  %v1487_v22 = vpop.f32.mrb[14].mxu0  ;;  %v1528_v23 = vpop.f32.mrb[26].mxu1  ;;  %v1532_v39 = vmul.f32 0.5, %v1485_v19 }
 0x990   : > { %v1535_v24 = vmul.f32 %v1533_v18, %v1483_v16  ;;  %v1488_v25 = vpop.f32.mrb[15].mxu0  ;;  %v1529_v32 = vpop.f32.mrb[27].mxu1 }
 0x991   : > { %v1536_v26 = vmul.f32 %v1534_v21, %v1485_v19 }
 0x992   : > { %v1537_v27 = vmul.f32 %v1535_v24, %v1483_v16 }
 0x993   : > { %v1538_v28 = vmul.f32 %v1536_v26, %v1485_v19 }
 0x994   : > { %v1539_v29 = vadd.f32 %v1537_v27, %v1483_v16 }
 0x995   : > { %v1540_v30 = vadd.f32 %v1538_v28, %v1485_v19 }
 0x996   : > { %v1541_v31 = vmul.f32 0.7978846, %v1539_v29 }
 0x997   : > { %v1542_v34 = vmul.f32 0.7978846, %v1540_v30 }
 0x998   : > { %2377 = vtanh.f32 %v1541_v31 }
 0x999   : > { %2379 = vtanh.f32 %v1542_v34 }
 0x9a2   : > { %v2378_v35 = vpop.eup %2377 }
 0x9a3   : > { %v2380_v36 = vpop.eup %2379  ;;  %v1545_v38 = vadd.f32 1.0, %v2378_v35 }
 0x9a4   : > { %v1546_v40 = vadd.f32 1.0, %v2380_v36 }
 0x9a5   : > { %v1547_v41 = vmul.f32 %v1545_v38, %v1531_v37 }
 0x9a6   : > { %v1548_v42 = vmul.f32 %v1546_v40, %v1532_v39 }
 0x9a7   : > { %v1549_v43 = vmul.f32 %v1547_v41, %v1524_v17 }
 0x9a8   : > { %v1550_v44 = vmul.f32 %v1548_v42, %v1526_v20 }
 0x9a9   : > { %v1551_v45 = vpack.c.bf16 %v1549_v43, %v1549_v43 }
 0x9aa   : > { %v1552_v0 = vpack.c.bf16 %v1550_v44, %v1550_v44 }
 0x9ac   : > { %1713 = vmatprep.mubr.bf16.mxu0 %v1552_v0 }
 0x9ad   : > { %1714 = vmatmul.mubr.bf16.vlgmr.msra.gmra.mrb[16].mxu0 %v1551_v45 }
 0xa80   : > { %v2035_v46 = vpop.f32.mrb[16].mxu0 }
 0xa81   : > { %v2036_v47 = vpop.f32.mrb[17].mxu0 }
 0xa82   : > { %v2037_v48 = vadd.f32 %v2036_v47, %v2035_v46  ;;  %v2038_v49 = vpop.f32.mrb[18].mxu0 }
 0xa83   : > { %v2039_v50 = vpop.f32.mrb[19].mxu0 }
 0xa84   : > { %v1721_v51 = vadd.f32 %v2037_v48, %v3002_v33 }
 0xa86   : > { %1722 = vst [vmem:[%s393_s18] sm:$0xff] %v1721_v51 }
 0xa87   : > { %2564 = shalt.err (!%p2561_p3)
}
 0xa88   : > { %s2565_s20 = scalar_lea.hbm %s3017_s9, 128  ;;  %s2569_s15 = scalar_lea.hbm %s3069_s8, 256 }
 0xa89   : > { %p2566_p6 = scmp.ne.s32.totalorder %s3017_s9, %s2565_s20  ;;  %p2570_p8 = scmp.lt.u32.totalorder %s3017_s9, %s3069_s8 }
 0xa8a   : > { %p2571_p0 = scmp.lt.u32.totalorder %s2569_s15, %s2565_s20  ;;  %p2573_p2 = scmp.lt.u32.totalorder %s2565_s20, %s3017_s9 }
 0xa8b   : > { %p2567_p9 = pnand %p2566_p6, %p3092_p7 }
 0xa8c   : > { %p2572_p5 = por %p2571_p0, %p2570_p8 }
 0xa8d   : > { %p2568_p4 = pneg %p2567_p9 }
 0xa8e   : > { %p2574_p10 = por %p2573_p2, %p2572_p5 }
 0xa90   : > { %p2575_p1 = pnand %p2574_p10, %p2568_p4 }
 0xa92   : > { %2578 = shalt.err (!%p2575_p1)
}
 0xa93   : > { %2127 = dma.vmem_to_hbm [thread:$0]  (%p3092_p7), %s3019_s17, 128, %s3017_s9, %s1724_s11  }
 0xa94 PF: > { %s1749_s14 = sand.u32 1, %s2617_s27   ;;  %p3093_p11 = scmp.ne.s32.totalorder %s3083_s26, 0 }
 0xa95   : > { %p3094_p12 = scmp.ge.s32.totalorder %s2629_s30, 2  ;;  %s1750_s25 = scalar_lea.sflag [#allocation4], %s1749_s14 }
 0xa97   : > { %p2150_p13 = pnand %p3094_p12, %p3093_p11 }
 0xa99   : > { %2612 = dma.done.wait (!%p2150_p13), %s1750_s25, 128  }
 0xa9a   : > { %2614 = vsyncadd (!%p2150_p13), %s1750_s25, 4294967168  ;;  %p24_p3 = scmp.ge.s32.totalorder %s2854_s23, 4   ;;  %s3095_s27 = smov %s2621_s28 }
 0xa9b   : > { %s3096_s28 = smov %s2625_s29  ;;  %s3097_s29 = smov %s2866_s22 }
 0xa9c   : > { %s3098_s30 = smov %s2854_s23  ;;  %26 = sbr.rel (!%p24_p3) target bundleno = 8 (0x8), region = 117 }
 0xaa3   :  { %1755 = vsyncpa [#allocation3], 1 }
 0xaa4   :  { %1757 = vsyncpa [#allocation3 + $0x1], 1 }
 0xaa5   :  { %1758 = vsyncpa [#allocation6], 1 }
 0xaa6   :  { %1759 = vsyncpa [#allocation9], 1 }
 0xaa7   :  { %1760 = vsyncpa [#allocation12], 1 }
 0xaa8   :  { %1761 = vsyncpa [#allocation4], 1 }
 0xaa9   :  { %1763 = vsyncpa [#allocation4 + $0x1], 1 }

</bundles_post_ra>
